<compile_context>
chip_gen: v5e
topology: v5e:2x2
jax: 0.10.0
libtpu: 0.0.40
codegen_flags: <defaults>
</compile_context>

<pallas_src>
import jax
import jax.numpy as jnp
from jax.experimental import pallas as pl
from jax.experimental.pallas import tpu as pltpu


# ----------------------------------------------------------------------------
# Fused  out = act( X @ W + bias )  Pallas kernel (BN scale pre-folded into W)
# ----------------------------------------------------------------------------
def _make_fused_kernel(apply_act: bool, neg_slope: float = 0.2):
    def kernel(x_ref, w_ref, b_ref, o_ref):
        y = jnp.dot(x_ref[...], w_ref[...], preferred_element_type=jnp.float32)
        y = y + b_ref[...]
        if apply_act:
            y = jnp.where(y >= 0.0, y, neg_slope * y)
        o_ref[...] = y.astype(o_ref.dtype)

    return kernel


def _choose_block_m(M, tm_max=512):
    """Pick the M tile: >=2 blocks when possible (megacore), capped at tm_max,
    8-aligned.  Tiny M uses a single full-extent block (no padding)."""
    if M <= 16:
        return M
    half = -(-M // 2)
    half = -(-half // 8) * 8
    return min(tm_max, half)


def fused_matmul(x, w, bias, *, apply_act, out_dtype=jnp.float32, tm_max=512):
    """out[m, n] = act( sum_k x[m,k] * w[k,n] + bias[n] ).

    x/w are fed to the MXU as bf16; accumulation / bias / activation in f32.
    Full-extent K and N blocks (no padded MXU work or HBM writes); only M is
    tiled and (rarely) padded.
    """
    M, K = x.shape
    K2, N = w.shape
    assert K == K2

    xb = x.astype(jnp.bfloat16)
    wb = w.astype(jnp.bfloat16)
    bb = bias.astype(jnp.float32).reshape(1, N)

    blk_m = _choose_block_m(M, tm_max)
    Mp = -(-M // blk_m) * blk_m
    if Mp != M:
        xb = jnp.pad(xb, ((0, Mp - M), (0, 0)))

    grid = (Mp // blk_m,)

    out = pl.pallas_call(
        _make_fused_kernel(apply_act),
        out_shape=jax.ShapeDtypeStruct((Mp, N), out_dtype),
        grid_spec=pltpu.PrefetchScalarGridSpec(
            num_scalar_prefetch=0,
            grid=grid,
            in_specs=[
                pl.BlockSpec((blk_m, K), lambda i: (i, 0)),
                pl.BlockSpec((K, N), lambda i: (0, 0)),
                pl.BlockSpec((1, N), lambda i: (0, 0)),
            ],
            out_specs=pl.BlockSpec((blk_m, N), lambda i: (i, 0)),
        ),
        compiler_params=pltpu.CompilerParams(
            dimension_semantics=("parallel",),
        ),
    )(xb, wb, bb)

    return out if Mp == M else out[:M]


# ----------------------------------------------------------------------------
# Glue: im2col, BN folding, weight reshaping
# ----------------------------------------------------------------------------
def im2col_nhwc(x, kernel, stride, pad):
    """x: (N, H, W, C) -> ((N*Ho*Wo, kernel*kernel*C), Ho, Wo).

    Patch element ordering is (kh, kw, c), matching a weight reshaped from
    (Kh, Kw, Cin, Cout).  Keeps the dtype of x (bf16 inside the model)."""
    N, H, W, C = x.shape
    xp = jnp.pad(x, ((0, 0), (pad, pad), (pad, pad), (0, 0)))
    Ho = (H + 2 * pad - kernel) // stride + 1
    Wo = (W + 2 * pad - kernel) // stride + 1
    cols = []
    for kh in range(kernel):
        for kw in range(kernel):
            cols.append(
                xp[:, kh:kh + stride * Ho:stride, kw:kw + stride * Wo:stride, :]
            )
    patches = jnp.concatenate(cols, axis=-1)  # (N, Ho, Wo, kernel*kernel*C)
    return patches.reshape(N * Ho * Wo, kernel * kernel * C), Ho, Wo


def conv_weight_to_mat(w_oihw, scale=None):
    """PyTorch OIHW -> (Kh*Kw*Cin, Cout) matching im2col ordering.
    Optionally folds a per-output-channel scale into the weights."""
    cout = w_oihw.shape[0]
    wmat = jnp.transpose(w_oihw, (2, 3, 1, 0)).reshape(-1, cout)
    if scale is not None:
        wmat = wmat * scale[None, :]
    return wmat


def bn_fold(gamma, beta, mean, var, eps=1e-5):
    scale = gamma / jnp.sqrt(var + eps)
    shift = beta - mean * scale
    return scale, shift


# ----------------------------------------------------------------------------
# Discriminator forward
# ----------------------------------------------------------------------------
def discriminator_forward(params, x_nchw, embd):
    x = jnp.transpose(x_nchw, (0, 2, 3, 1)).astype(jnp.bfloat16)  # -> NHWC bf16
    batch = x.shape[0]

    # main: 4 x (Conv(4,2,1,no bias) + BN2d + LeakyReLU(0.2))
    for layer in params["main"]:
        cols, Ho, Wo = im2col_nhwc(x, 4, 2, 1)
        cout = layer["w"].shape[0]
        scale, shift = bn_fold(
            layer["gamma"], layer["beta"], layer["mean"], layer["var"]
        )
        wmat = conv_weight_to_mat(layer["w"], scale)  # BN scale folded into W
        out = fused_matmul(cols, wmat, shift, apply_act=True,
                           out_dtype=jnp.bfloat16)
        x = out.reshape(batch, Ho, Wo, cout)

    # projected_dim: Linear + BN1d + LeakyReLU(0.2)
    p = params["proj"]
    scale, shift = bn_fold(p["gamma"], p["beta"], p["mean"], p["var"])
    wmat = p["w"].T * scale[None, :]          # scale folded into the weights
    lin_bias = p["b"] * scale + shift          # Linear bias folded into shift
    proj = fused_matmul(embd, wmat, lin_bias, apply_act=True,
                        out_dtype=jnp.bfloat16)  # (N, proj_dim)

    # broadcast projection over spatial dims and concat (projection first,
    # matching torch.cat([proj_embd, x], dim=1))
    _, H, W, _ = x.shape
    P = proj.shape[1]
    proj_b = jnp.broadcast_to(proj[:, None, None, :], (batch, H, W, P))
    cat = jnp.concatenate([proj_b, x], axis=-1)

    # score: Conv2d(c_dim*8 + proj_dim, 1, 4, 2, 0, bias=False), no activation
    cols, Ho, Wo = im2col_nhwc(cat, 4, 2, 0)
    wmat = conv_weight_to_mat(params["score"]["w"])
    zeros = jnp.zeros((1,), jnp.float32)
    out = fused_matmul(cols, wmat, zeros, apply_act=False,
                       out_dtype=jnp.float32)
    out = out.reshape(batch, Ho, Wo, 1)
    return jnp.transpose(out, (0, 3, 1, 2))  # back to NCHW


# ----------------------------------------------------------------------------
# Deterministic parameter initialization (same shapes as the torch module)
# ----------------------------------------------------------------------------
def init_params(key, input_dim, c_dim, embd_dim, proj_dim):
    keys = iter(jax.random.split(key, 64))
    nk = lambda: next(keys)

    params = {"main": []}
    chans = [input_dim, c_dim, c_dim * 2, c_dim * 4, c_dim * 8]
    for i in range(4):
        cin, cout = chans[i], chans[i + 1]
        params["main"].append(
            {
                "w": 0.05 * jax.random.normal(nk(), (cout, cin, 4, 4), jnp.float32),
                "gamma": 1.0 + 0.1 * jax.random.normal(nk(), (cout,), jnp.float32),
                "beta": 0.1 * jax.random.normal(nk(), (cout,), jnp.float32),
                "mean": 0.1 * jax.random.normal(nk(), (cout,), jnp.float32),
                "var": 0.5 + 0.5 * jax.random.uniform(nk(), (cout,), jnp.float32),
            }
        )
    params["proj"] = {
        "w": 0.05 * jax.random.normal(nk(), (proj_dim, embd_dim), jnp.float32),
        "b": 0.05 * jax.random.normal(nk(), (proj_dim,), jnp.float32),
        "gamma": 1.0 + 0.1 * jax.random.normal(nk(), (proj_dim,), jnp.float32),
        "beta": 0.1 * jax.random.normal(nk(), (proj_dim,), jnp.float32),
        "mean": 0.1 * jax.random.normal(nk(), (proj_dim,), jnp.float32),
        "var": 0.5 + 0.5 * jax.random.uniform(nk(), (proj_dim,), jnp.float32),
    }
    params["score"] = {
        "w": 0.05
        * jax.random.normal(nk(), (1, c_dim * 8 + proj_dim, 4, 4), jnp.float32)
    }
    return params


if __name__ == "__main__":
    # small-but-consistent config: image must reach 4x4 before the score conv
    input_dim, c_dim, embd_dim, proj_dim = 3, 8, 32, 16
    batch, H, W = 2, 64, 64

    root = jax.random.PRNGKey(0)
    kp, kx, ke = jax.random.split(root, 3)

    params = init_params(kp, input_dim, c_dim, embd_dim, proj_dim)
    x = jax.random.normal(kx, (batch, input_dim, H, W), jnp.float32)
    embd = jax.random.normal(ke, (batch, embd_dim), jnp.float32)

    fwd = jax.jit(discriminator_forward)
    out = fwd(params, x, embd)
    out = jax.block_until_ready(out)

    assert out.shape == (batch, 1, 1, 1), out.shape
    assert out.dtype == jnp.float32
    print("KERNEL_OK")
</pallas_src>

<mosaic_0001>
module attributes {stable_mosaic.version = 11 : i64} {
  func.func @kernel(%arg0: i32, %arg1: memref<512x48xbf16, #tpu.memory_space<vmem>>, %arg2: memref<48x8xbf16, #tpu.memory_space<vmem>>, %arg3: memref<1x8xf32, #tpu.memory_space<vmem>>, %arg4: memref<512x8xbf16, #tpu.memory_space<vmem>>) attributes {dimension_semantics = [#tpu.dimension_semantics<parallel>], iteration_bounds = array<i64: 4>, scalar_prefetch = 0 : i64, scratch_operands = 0 : i64, tpu.core_type = #tpu.core_type<tc>, window_params = [{transform_indices = @transform_0, window_bounds = array<i64: 512, 48>}, {pipeline_mode = #tpu.pipeline_mode<synchronous>, transform_indices = @transform_1, window_bounds = array<i64: 48, 8>}, {pipeline_mode = #tpu.pipeline_mode<synchronous>, transform_indices = @transform_2, window_bounds = array<i64: 1, 8>}, {transform_indices = @transform_3, window_bounds = array<i64: 512, 8>}]} {
    %c0 = arith.constant 0 : index
    %c0_0 = arith.constant 0 : index
    %0 = vector.load %arg1[%c0, %c0_0] : memref<512x48xbf16, #tpu.memory_space<vmem>>, vector<512x48xbf16>
    %c0_1 = arith.constant 0 : index
    %c0_2 = arith.constant 0 : index
    %1 = vector.load %arg2[%c0_1, %c0_2] : memref<48x8xbf16, #tpu.memory_space<vmem>>, vector<48x8xbf16>
    %cst = arith.constant dense<0.000000e+00> : vector<512x8xf32>
    %2 = tpu.matmul %0, %1, %cst {dimension_numbers = #tpu.dot_dimension_numbers<[1], [0], [0], [1], [0, 0, 1, 1], [], []>} : vector<512x48xbf16>, vector<48x8xbf16>, vector<512x8xf32> -> vector<512x8xf32>
    %c0_3 = arith.constant 0 : index
    %c0_4 = arith.constant 0 : index
    %3 = vector.load %arg3[%c0_3, %c0_4] : memref<1x8xf32, #tpu.memory_space<vmem>>, vector<1x8xf32>
    %4 = vector.broadcast %3 : vector<1x8xf32> to vector<512x8xf32>
    %5 = arith.addf %2, %4 : vector<512x8xf32>
    %cst_5 = arith.constant 0.000000e+00 : f32
    %6 = vector.broadcast %cst_5 : f32 to vector<512x8xf32>
    %7 = arith.cmpf oge, %5, %6 : vector<512x8xf32>
    %cst_6 = arith.constant 2.000000e-01 : f32
    %8 = vector.broadcast %cst_6 : f32 to vector<512x8xf32>
    %9 = arith.mulf %8, %5 : vector<512x8xf32>
    %10 = arith.select %7, %5, %9 : vector<512x8xi1>, vector<512x8xf32>
    %11 = arith.truncf %10 : vector<512x8xf32> to vector<512x8xbf16>
    %c0_7 = arith.constant 0 : index
    %c0_8 = arith.constant 0 : index
    %12 = vector.load %arg4[%c0_7, %c0_8] : memref<512x8xbf16, #tpu.memory_space<vmem>>, vector<512x8xbf16>
    tpu.vector_store %arg4[%c0_7, %c0_8], %11 {strides = array<i32>} : memref<512x8xbf16, #tpu.memory_space<vmem>>, vector<512x8xbf16>,
    return
  }
  func.func @transform_0(%arg0: i32) -> (i32, i32) {
    %c0_i32 = arith.constant 0 : i32
    %c0_i32_0 = arith.constant 0 : i32
    return %arg0, %c0_i32 : i32, i32
  }
  func.func @transform_1(%arg0: i32) -> (i32, i32) {
    %c0_i32 = arith.constant 0 : i32
    %c0_i32_0 = arith.constant 0 : i32
    %c0_i32_1 = arith.constant 0 : i32
    return %c0_i32, %c0_i32_0 : i32, i32
  }
  func.func @transform_2(%arg0: i32) -> (i32, i32) {
    %c0_i32 = arith.constant 0 : i32
    %c0_i32_0 = arith.constant 0 : i32
    %c0_i32_1 = arith.constant 0 : i32
    return %c0_i32, %c0_i32_0 : i32, i32
  }
  func.func @transform_3(%arg0: i32) -> (i32, i32) {
    %c0_i32 = arith.constant 0 : i32
    %c0_i32_0 = arith.constant 0 : i32
    return %arg0, %c0_i32 : i32, i32
  }
}

module attributes {stable_mosaic.version = 11 : i64} {
  func.func @kernel(%arg0: i32, %arg1: memref<256x128xbf16, #tpu.memory_space<vmem>>, %arg2: memref<128x16xbf16, #tpu.memory_space<vmem>>, %arg3: memref<1x16xf32, #tpu.memory_space<vmem>>, %arg4: memref<256x16xbf16, #tpu.memory_space<vmem>>) attributes {dimension_semantics = [#tpu.dimension_semantics<parallel>], iteration_bounds = array<i64: 2>, scalar_prefetch = 0 : i64, scratch_operands = 0 : i64, tpu.core_type = #tpu.core_type<tc>, window_params = [{transform_indices = @transform_0, window_bounds = array<i64: 256, 128>}, {pipeline_mode = #tpu.pipeline_mode<synchronous>, transform_indices = @transform_1, window_bounds = array<i64: 128, 16>}, {pipeline_mode = #tpu.pipeline_mode<synchronous>, transform_indices = @transform_2, window_bounds = array<i64: 1, 16>}, {transform_indices = @transform_3, window_bounds = array<i64: 256, 16>}]} {
    %c0 = arith.constant 0 : index
    %c0_0 = arith.constant 0 : index
    %0 = vector.load %arg1[%c0, %c0_0] : memref<256x128xbf16, #tpu.memory_space<vmem>>, vector<256x128xbf16>
    %c0_1 = arith.constant 0 : index
    %c0_2 = arith.constant 0 : index
    %1 = vector.load %arg2[%c0_1, %c0_2] : memref<128x16xbf16, #tpu.memory_space<vmem>>, vector<128x16xbf16>
    %cst = arith.constant dense<0.000000e+00> : vector<256x16xf32>
    %2 = tpu.matmul %0, %1, %cst {dimension_numbers = #tpu.dot_dimension_numbers<[1], [0], [0], [1], [0, 0, 1, 1], [], []>} : vector<256x128xbf16>, vector<128x16xbf16>, vector<256x16xf32> -> vector<256x16xf32>
    %c0_3 = arith.constant 0 : index
    %c0_4 = arith.constant 0 : index
    %3 = vector.load %arg3[%c0_3, %c0_4] : memref<1x16xf32, #tpu.memory_space<vmem>>, vector<1x16xf32>
    %4 = vector.broadcast %3 : vector<1x16xf32> to vector<256x16xf32>
    %5 = arith.addf %2, %4 : vector<256x16xf32>
    %cst_5 = arith.constant 0.000000e+00 : f32
    %6 = vector.broadcast %cst_5 : f32 to vector<256x16xf32>
    %7 = arith.cmpf oge, %5, %6 : vector<256x16xf32>
    %cst_6 = arith.constant 2.000000e-01 : f32
    %8 = vector.broadcast %cst_6 : f32 to vector<256x16xf32>
    %9 = arith.mulf %8, %5 : vector<256x16xf32>
    %10 = arith.select %7, %5, %9 : vector<256x16xi1>, vector<256x16xf32>
    %11 = arith.truncf %10 : vector<256x16xf32> to vector<256x16xbf16>
    %c0_7 = arith.constant 0 : index
    %c0_8 = arith.constant 0 : index
    %12 = vector.load %arg4[%c0_7, %c0_8] : memref<256x16xbf16, #tpu.memory_space<vmem>>, vector<256x16xbf16>
    tpu.vector_store %arg4[%c0_7, %c0_8], %11 {strides = array<i32>} : memref<256x16xbf16, #tpu.memory_space<vmem>>, vector<256x16xbf16>,
    return
  }
  func.func @transform_0(%arg0: i32) -> (i32, i32) {
    %c0_i32 = arith.constant 0 : i32
    %c0_i32_0 = arith.constant 0 : i32
    return %arg0, %c0_i32 : i32, i32
  }
  func.func @transform_1(%arg0: i32) -> (i32, i32) {
    %c0_i32 = arith.constant 0 : i32
    %c0_i32_0 = arith.constant 0 : i32
    %c0_i32_1 = arith.constant 0 : i32
    return %c0_i32, %c0_i32_0 : i32, i32
  }
  func.func @transform_2(%arg0: i32) -> (i32, i32) {
    %c0_i32 = arith.constant 0 : i32
    %c0_i32_0 = arith.constant 0 : i32
    %c0_i32_1 = arith.constant 0 : i32
    return %c0_i32, %c0_i32_0 : i32, i32
  }
  func.func @transform_3(%arg0: i32) -> (i32, i32) {
    %c0_i32 = arith.constant 0 : i32
    %c0_i32_0 = arith.constant 0 : i32
    return %arg0, %c0_i32 : i32, i32
  }
}

module attributes {stable_mosaic.version = 11 : i64} {
  func.func @kernel(%arg0: i32, %arg1: memref<64x256xbf16, #tpu.memory_space<vmem>>, %arg2: memref<256x32xbf16, #tpu.memory_space<vmem>>, %arg3: memref<1x32xf32, #tpu.memory_space<vmem>>, %arg4: memref<64x32xbf16, #tpu.memory_space<vmem>>) attributes {dimension_semantics = [#tpu.dimension_semantics<parallel>], iteration_bounds = array<i64: 2>, scalar_prefetch = 0 : i64, scratch_operands = 0 : i64, tpu.core_type = #tpu.core_type<tc>, window_params = [{transform_indices = @transform_0, window_bounds = array<i64: 64, 256>}, {pipeline_mode = #tpu.pipeline_mode<synchronous>, transform_indices = @transform_1, window_bounds = array<i64: 256, 32>}, {pipeline_mode = #tpu.pipeline_mode<synchronous>, transform_indices = @transform_2, window_bounds = array<i64: 1, 32>}, {transform_indices = @transform_3, window_bounds = array<i64: 64, 32>}]} {
    %c0 = arith.constant 0 : index
    %c0_0 = arith.constant 0 : index
    %0 = vector.load %arg1[%c0, %c0_0] : memref<64x256xbf16, #tpu.memory_space<vmem>>, vector<64x256xbf16>
    %c0_1 = arith.constant 0 : index
    %c0_2 = arith.constant 0 : index
    %1 = vector.load %arg2[%c0_1, %c0_2] : memref<256x32xbf16, #tpu.memory_space<vmem>>, vector<256x32xbf16>
    %cst = arith.constant dense<0.000000e+00> : vector<64x32xf32>
    %2 = tpu.matmul %0, %1, %cst {dimension_numbers = #tpu.dot_dimension_numbers<[1], [0], [0], [1], [0, 0, 1, 1], [], []>} : vector<64x256xbf16>, vector<256x32xbf16>, vector<64x32xf32> -> vector<64x32xf32>
    %c0_3 = arith.constant 0 : index
    %c0_4 = arith.constant 0 : index
    %3 = vector.load %arg3[%c0_3, %c0_4] : memref<1x32xf32, #tpu.memory_space<vmem>>, vector<1x32xf32>
    %4 = vector.broadcast %3 : vector<1x32xf32> to vector<64x32xf32>
    %5 = arith.addf %2, %4 : vector<64x32xf32>
    %cst_5 = arith.constant 0.000000e+00 : f32
    %6 = vector.broadcast %cst_5 : f32 to vector<64x32xf32>
    %7 = arith.cmpf oge, %5, %6 : vector<64x32xf32>
    %cst_6 = arith.constant 2.000000e-01 : f32
    %8 = vector.broadcast %cst_6 : f32 to vector<64x32xf32>
    %9 = arith.mulf %8, %5 : vector<64x32xf32>
    %10 = arith.select %7, %5, %9 : vector<64x32xi1>, vector<64x32xf32>
    %11 = arith.truncf %10 : vector<64x32xf32> to vector<64x32xbf16>
    %c0_7 = arith.constant 0 : index
    %c0_8 = arith.constant 0 : index
    %12 = vector.load %arg4[%c0_7, %c0_8] : memref<64x32xbf16, #tpu.memory_space<vmem>>, vector<64x32xbf16>
    tpu.vector_store %arg4[%c0_7, %c0_8], %11 {strides = array<i32>} : memref<64x32xbf16, #tpu.memory_space<vmem>>, vector<64x32xbf16>,
    return
  }
  func.func @transform_0(%arg0: i32) -> (i32, i32) {
    %c0_i32 = arith.constant 0 : i32
    %c0_i32_0 = arith.constant 0 : i32
    return %arg0, %c0_i32 : i32, i32
  }
  func.func @transform_1(%arg0: i32) -> (i32, i32) {
    %c0_i32 = arith.constant 0 : i32
    %c0_i32_0 = arith.constant 0 : i32
    %c0_i32_1 = arith.constant 0 : i32
    return %c0_i32, %c0_i32_0 : i32, i32
  }
  func.func @transform_2(%arg0: i32) -> (i32, i32) {
    %c0_i32 = arith.constant 0 : i32
    %c0_i32_0 = arith.constant 0 : i32
    %c0_i32_1 = arith.constant 0 : i32
    return %c0_i32, %c0_i32_0 : i32, i32
  }
  func.func @transform_3(%arg0: i32) -> (i32, i32) {
    %c0_i32 = arith.constant 0 : i32
    %c0_i32_0 = arith.constant 0 : i32
    return %arg0, %c0_i32 : i32, i32
  }
}

module attributes {stable_mosaic.version = 11 : i64} {
  func.func @kernel(%arg0: i32, %arg1: memref<16x512xbf16, #tpu.memory_space<vmem>>, %arg2: memref<512x64xbf16, #tpu.memory_space<vmem>>, %arg3: memref<1x64xf32, #tpu.memory_space<vmem>>, %arg4: memref<16x64xbf16, #tpu.memory_space<vmem>>) attributes {dimension_semantics = [#tpu.dimension_semantics<parallel>], iteration_bounds = array<i64: 2>, scalar_prefetch = 0 : i64, scratch_operands = 0 : i64, tpu.core_type = #tpu.core_type<tc>, window_params = [{transform_indices = @transform_0, window_bounds = array<i64: 16, 512>}, {pipeline_mode = #tpu.pipeline_mode<synchronous>, transform_indices = @transform_1, window_bounds = array<i64: 512, 64>}, {pipeline_mode = #tpu.pipeline_mode<synchronous>, transform_indices = @transform_2, window_bounds = array<i64: 1, 64>}, {transform_indices = @transform_3, window_bounds = array<i64: 16, 64>}]} {
    %c0 = arith.constant 0 : index
    %c0_0 = arith.constant 0 : index
    %0 = vector.load %arg1[%c0, %c0_0] : memref<16x512xbf16, #tpu.memory_space<vmem>>, vector<16x512xbf16>
    %c0_1 = arith.constant 0 : index
    %c0_2 = arith.constant 0 : index
    %1 = vector.load %arg2[%c0_1, %c0_2] : memref<512x64xbf16, #tpu.memory_space<vmem>>, vector<512x64xbf16>
    %cst = arith.constant dense<0.000000e+00> : vector<16x64xf32>
    %2 = tpu.matmul %0, %1, %cst {dimension_numbers = #tpu.dot_dimension_numbers<[1], [0], [0], [1], [0, 0, 1, 1], [], []>} : vector<16x512xbf16>, vector<512x64xbf16>, vector<16x64xf32> -> vector<16x64xf32>
    %c0_3 = arith.constant 0 : index
    %c0_4 = arith.constant 0 : index
    %3 = vector.load %arg3[%c0_3, %c0_4] : memref<1x64xf32, #tpu.memory_space<vmem>>, vector<1x64xf32>
    %4 = vector.broadcast %3 : vector<1x64xf32> to vector<16x64xf32>
    %5 = arith.addf %2, %4 : vector<16x64xf32>
    %cst_5 = arith.constant 0.000000e+00 : f32
    %6 = vector.broadcast %cst_5 : f32 to vector<16x64xf32>
    %7 = arith.cmpf oge, %5, %6 : vector<16x64xf32>
    %cst_6 = arith.constant 2.000000e-01 : f32
    %8 = vector.broadcast %cst_6 : f32 to vector<16x64xf32>
    %9 = arith.mulf %8, %5 : vector<16x64xf32>
    %10 = arith.select %7, %5, %9 : vector<16x64xi1>, vector<16x64xf32>
    %11 = arith.truncf %10 : vector<16x64xf32> to vector<16x64xbf16>
    %c0_7 = arith.constant 0 : index
    %c0_8 = arith.constant 0 : index
    %12 = vector.load %arg4[%c0_7, %c0_8] : memref<16x64xbf16, #tpu.memory_space<vmem>>, vector<16x64xbf16>
    tpu.vector_store %arg4[%c0_7, %c0_8], %11 {strides = array<i32>} : memref<16x64xbf16, #tpu.memory_space<vmem>>, vector<16x64xbf16>,
    return
  }
  func.func @transform_0(%arg0: i32) -> (i32, i32) {
    %c0_i32 = arith.constant 0 : i32
    %c0_i32_0 = arith.constant 0 : i32
    return %arg0, %c0_i32 : i32, i32
  }
  func.func @transform_1(%arg0: i32) -> (i32, i32) {
    %c0_i32 = arith.constant 0 : i32
    %c0_i32_0 = arith.constant 0 : i32
    %c0_i32_1 = arith.constant 0 : i32
    return %c0_i32, %c0_i32_0 : i32, i32
  }
  func.func @transform_2(%arg0: i32) -> (i32, i32) {
    %c0_i32 = arith.constant 0 : i32
    %c0_i32_0 = arith.constant 0 : i32
    %c0_i32_1 = arith.constant 0 : i32
    return %c0_i32, %c0_i32_0 : i32, i32
  }
  func.func @transform_3(%arg0: i32) -> (i32, i32) {
    %c0_i32 = arith.constant 0 : i32
    %c0_i32_0 = arith.constant 0 : i32
    return %arg0, %c0_i32 : i32, i32
  }
}

module attributes {stable_mosaic.version = 11 : i64} {
  func.func @kernel(%arg0: i32, %arg1: memref<2x32xbf16, #tpu.memory_space<vmem>>, %arg2: memref<32x16xbf16, #tpu.memory_space<vmem>>, %arg3: memref<1x16xf32, #tpu.memory_space<vmem>>, %arg4: memref<2x16xbf16, #tpu.memory_space<vmem>>) attributes {dimension_semantics = [#tpu.dimension_semantics<parallel>], iteration_bounds = array<i64: 1>, scalar_prefetch = 0 : i64, scratch_operands = 0 : i64, tpu.core_type = #tpu.core_type<tc>, window_params = [{transform_indices = @transform_0, window_bounds = array<i64: 2, 32>}, {pipeline_mode = #tpu.pipeline_mode<synchronous>, transform_indices = @transform_1, window_bounds = array<i64: 32, 16>}, {pipeline_mode = #tpu.pipeline_mode<synchronous>, transform_indices = @transform_2, window_bounds = array<i64: 1, 16>}, {transform_indices = @transform_3, window_bounds = array<i64: 2, 16>}]} {
    %c0 = arith.constant 0 : index
    %c0_0 = arith.constant 0 : index
    %0 = vector.load %arg1[%c0, %c0_0] : memref<2x32xbf16, #tpu.memory_space<vmem>>, vector<2x32xbf16>
    %c0_1 = arith.constant 0 : index
    %c0_2 = arith.constant 0 : index
    %1 = vector.load %arg2[%c0_1, %c0_2] : memref<32x16xbf16, #tpu.memory_space<vmem>>, vector<32x16xbf16>
    %cst = arith.constant dense<0.000000e+00> : vector<2x16xf32>
    %2 = tpu.matmul %0, %1, %cst {dimension_numbers = #tpu.dot_dimension_numbers<[1], [0], [0], [1], [0, 0, 1, 1], [], []>} : vector<2x32xbf16>, vector<32x16xbf16>, vector<2x16xf32> -> vector<2x16xf32>
    %c0_3 = arith.constant 0 : index
    %c0_4 = arith.constant 0 : index
    %3 = vector.load %arg3[%c0_3, %c0_4] : memref<1x16xf32, #tpu.memory_space<vmem>>, vector<1x16xf32>
    %4 = vector.broadcast %3 : vector<1x16xf32> to vector<2x16xf32>
    %5 = arith.addf %2, %4 : vector<2x16xf32>
    %cst_5 = arith.constant 0.000000e+00 : f32
    %6 = vector.broadcast %cst_5 : f32 to vector<2x16xf32>
    %7 = arith.cmpf oge, %5, %6 : vector<2x16xf32>
    %cst_6 = arith.constant 2.000000e-01 : f32
    %8 = vector.broadcast %cst_6 : f32 to vector<2x16xf32>
    %9 = arith.mulf %8, %5 : vector<2x16xf32>
    %10 = arith.select %7, %5, %9 : vector<2x16xi1>, vector<2x16xf32>
    %11 = arith.truncf %10 : vector<2x16xf32> to vector<2x16xbf16>
    %c0_7 = arith.constant 0 : index
    %c0_8 = arith.constant 0 : index
    %12 = vector.load %arg4[%c0_7, %c0_8] : memref<2x16xbf16, #tpu.memory_space<vmem>>, vector<2x16xbf16>
    tpu.vector_store %arg4[%c0_7, %c0_8], %11 {strides = array<i32>} : memref<2x16xbf16, #tpu.memory_space<vmem>>, vector<2x16xbf16>,
    return
  }
  func.func @transform_0(%arg0: i32) -> (i32, i32) {
    %c0_i32 = arith.constant 0 : i32
    %c0_i32_0 = arith.constant 0 : i32
    return %arg0, %c0_i32 : i32, i32
  }
  func.func @transform_1(%arg0: i32) -> (i32, i32) {
    %c0_i32 = arith.constant 0 : i32
    %c0_i32_0 = arith.constant 0 : i32
    %c0_i32_1 = arith.constant 0 : i32
    return %c0_i32, %c0_i32_0 : i32, i32
  }
  func.func @transform_2(%arg0: i32) -> (i32, i32) {
    %c0_i32 = arith.constant 0 : i32
    %c0_i32_0 = arith.constant 0 : i32
    %c0_i32_1 = arith.constant 0 : i32
    return %c0_i32, %c0_i32_0 : i32, i32
  }
  func.func @transform_3(%arg0: i32) -> (i32, i32) {
    %c0_i32 = arith.constant 0 : i32
    %c0_i32_0 = arith.constant 0 : i32
    return %arg0, %c0_i32 : i32, i32
  }
}

module attributes {stable_mosaic.version = 11 : i64} {
  func.func @kernel(%arg0: i32, %arg1: memref<2x1280xbf16, #tpu.memory_space<vmem>>, %arg2: memref<1280x1xbf16, #tpu.memory_space<vmem>>, %arg3: memref<1x1xf32, #tpu.memory_space<vmem>>, %arg4: memref<2x1xf32, #tpu.memory_space<vmem>>) attributes {dimension_semantics = [#tpu.dimension_semantics<parallel>], iteration_bounds = array<i64: 1>, scalar_prefetch = 0 : i64, scratch_operands = 0 : i64, tpu.core_type = #tpu.core_type<tc>, window_params = [{transform_indices = @transform_0, window_bounds = array<i64: 2, 1280>}, {pipeline_mode = #tpu.pipeline_mode<synchronous>, transform_indices = @transform_1, window_bounds = array<i64: 1280, 1>}, {pipeline_mode = #tpu.pipeline_mode<synchronous>, transform_indices = @transform_2, window_bounds = array<i64: 1, 1>}, {transform_indices = @transform_3, window_bounds = array<i64: 2, 1>}]} {
    %c0 = arith.constant 0 : index
    %c0_0 = arith.constant 0 : index
    %0 = vector.load %arg1[%c0, %c0_0] : memref<2x1280xbf16, #tpu.memory_space<vmem>>, vector<2x1280xbf16>
    %c0_1 = arith.constant 0 : index
    %c0_2 = arith.constant 0 : index
    %1 = vector.load %arg2[%c0_1, %c0_2] : memref<1280x1xbf16, #tpu.memory_space<vmem>>, vector<1280x1xbf16>
    %cst = arith.constant dense<0.000000e+00> : vector<2x1xf32>
    %2 = tpu.matmul %0, %1, %cst {dimension_numbers = #tpu.dot_dimension_numbers<[1], [0], [0], [1], [0, 0, 1, 1], [], []>} : vector<2x1280xbf16>, vector<1280x1xbf16>, vector<2x1xf32> -> vector<2x1xf32>
    %c0_3 = arith.constant 0 : index
    %c0_4 = arith.constant 0 : index
    %3 = vector.load %arg3[%c0_3, %c0_4] : memref<1x1xf32, #tpu.memory_space<vmem>>, vector<1x1xf32>
    %4 = vector.broadcast %3 : vector<1x1xf32> to vector<2x1xf32>
    %5 = arith.addf %2, %4 : vector<2x1xf32>
    %c0_5 = arith.constant 0 : index
    %c0_6 = arith.constant 0 : index
    %6 = vector.load %arg4[%c0_5, %c0_6] : memref<2x1xf32, #tpu.memory_space<vmem>>, vector<2x1xf32>
    tpu.vector_store %arg4[%c0_5, %c0_6], %5 {strides = array<i32>} : memref<2x1xf32, #tpu.memory_space<vmem>>, vector<2x1xf32>,
    return
  }
  func.func @transform_0(%arg0: i32) -> (i32, i32) {
    %c0_i32 = arith.constant 0 : i32
    %c0_i32_0 = arith.constant 0 : i32
    return %arg0, %c0_i32 : i32, i32
  }
  func.func @transform_1(%arg0: i32) -> (i32, i32) {
    %c0_i32 = arith.constant 0 : i32
    %c0_i32_0 = arith.constant 0 : i32
    %c0_i32_1 = arith.constant 0 : i32
    return %c0_i32, %c0_i32_0 : i32, i32
  }
  func.func @transform_2(%arg0: i32) -> (i32, i32) {
    %c0_i32 = arith.constant 0 : i32
    %c0_i32_0 = arith.constant 0 : i32
    %c0_i32_1 = arith.constant 0 : i32
    return %c0_i32, %c0_i32_0 : i32, i32
  }
  func.func @transform_3(%arg0: i32) -> (i32, i32) {
    %c0_i32 = arith.constant 0 : i32
    %c0_i32_0 = arith.constant 0 : i32
    return %arg0, %c0_i32 : i32, i32
  }
}

</mosaic_0001>

<bundles_post_ra>
// kernel: discriminator_forward.6
= control target key start
LH: loop header
LB: loop body
LE: loop exit
PB: predicated region body
PF: predicated region fallthrough
CT: control target
= control target key end

     0   :  { %s1334_s12 = smov 0   ;;  %s1632_s0 = inlined_call_operand.vmem [shape: bf16[2048,48], index: 0, kind: input, shape index: {}]   ;;  %s1633_s1 = inlined_call_operand.vmem [shape: bf16[48,8], index: 1, kind: input, shape index: {}]   ;;  %s1634_s2 = inlined_call_operand.vmem [shape: f32[1,8], index: 2, kind: input, shape index: {}]   ;;  %s1635_s3 = inlined_call_operand.vmem [shape: bf16[2048,8], index: 3, kind: output, shape index: {}]  }
   0x1 LB: > { %s1070_s13 = sadd.s32 4294967295, %s1312_s12   ;;  %p1074_p0 = scmp.ge.s32.totalorder %s1312_s12, 1  ;;  %s1312_s12 = sphi %s1334_s12, %s13_s12  }
   0x2   : > { %p138_p1 = scmp.lt.s32.totalorder %s1312_s12, 5 }
   0x4   : > { %p139_p2 = pnand %p1074_p0, %p138_p1 }
   0x5   : > { %s1075_s16 = sshll.u32 (!%p139_p2), %s1070_s13, 6 }
   0x6   : > { %142 = sbr.rel (%p139_p2) target bundleno = 285 (0x11d), region = 32  ;;  %p163_p3 = scmp.lt.s32.totalorder (!%p139_p2), %s1075_s16, 255 }
   0xb   : > { %v1287_v0 = vld [vmem:[%s1633_s1 + $0x10] sm:$0xff]  ;;  %v1286_v1 = vld [vmem:[%s1633_s1 + $0x8] sm:$0xff]  ;;  %s1637_s16 = smov (!%p163_p3, %s1075_s16), 255  ;;  %v1285_v2 = vld [vmem:[%s1633_s1] sm:$0xff]  ;;  %vm427_vm0 = vcmask 392192   ;;  %vm949_vm3 = vcmask 60416  }
   0xc   : > { %529 = vmatpush.bf16.msra.mxu0 %v1287_v0  ;;  %1288 = vmatpush.bf16.msra.mxu1 %v1287_v0  ;;  %s1076_s19 = sshll.u32 %s1637_s16, 2  ;;  %v1428_v35 = vld [vmem:[%s1634_s2] ss:$0 sm:$0xff] }
   0xd   : > { %1289 = vmatpush.bf16.msra.mxu2 %v1287_v0  ;;  %1290 = vmatpush.bf16.msra.mxu3 %v1287_v0  ;;  %s1359_s24 = scalar_lea.vmem %s1632_s0, %s1076_s19  ;;  %s1437_s29 = scalar_lea.vmem %s1635_s3, %s1076_s19 }
   0xe   : > { %v1253_v3 = vld [vmem:[%s1359_s24] sm:$0xff]  ;;  %v1254_v7 = vld [vmem:[%s1359_s24 + $0x8] sm:$0xff]  ;;  %v1255_v11 = vld [vmem:[%s1359_s24 + $0x10] sm:$0xff] }
   0xf   : > { %v1261_v4 = vld [vmem:[%s1359_s24 + $0x40] sm:$0xff]  ;;  %v1262_v8 = vld [vmem:[%s1359_s24 + $0x48] sm:$0xff]  ;;  %v1263_v12 = vld [vmem:[%s1359_s24 + $0x50] sm:$0xff] }
  0x10   : > { %530 = vmatpush.bf16.msra.mxu0 %v1286_v1  ;;  %1291 = vmatpush.bf16.msra.mxu1 %v1286_v1  ;;  %v1269_v5 = vld [vmem:[%s1359_s24 + $0x80] sm:$0xff]  ;;  %v1270_v9 = vld [vmem:[%s1359_s24 + $0x88] sm:$0xff]  ;;  %v1271_v13 = vld [vmem:[%s1359_s24 + $0x90] sm:$0xff] }
  0x11   : > { %1292 = vmatpush.bf16.msra.mxu2 %v1286_v1  ;;  %1293 = vmatpush.bf16.msra.mxu3 %v1286_v1  ;;  %v1277_v6 = vld [vmem:[%s1359_s24 + $0xc0] sm:$0xff]  ;;  %v1278_v10 = vld [vmem:[%s1359_s24 + $0xc8] sm:$0xff]  ;;  %v1279_v14 = vld [vmem:[%s1359_s24 + $0xd0] sm:$0xff] }
  0x12   : > { %v1256_v15 = vld [vmem:[%s1359_s24 + $0x18] sm:$0xff]  ;;  %v1257_v19 = vld [vmem:[%s1359_s24 + $0x20] sm:$0xff]  ;;  %v1258_v23 = vld [vmem:[%s1359_s24 + $0x28] sm:$0xff] }
  0x13   : > { %v1264_v16 = vld [vmem:[%s1359_s24 + $0x58] sm:$0xff]  ;;  %v1265_v20 = vld [vmem:[%s1359_s24 + $0x60] sm:$0xff]  ;;  %v1266_v24 = vld [vmem:[%s1359_s24 + $0x68] sm:$0xff] }
  0x14   : > { %531 = vmatpush.bf16.msra.mxu0 %v1285_v2  ;;  %1294 = vmatpush.bf16.msra.mxu1 %v1285_v2  ;;  %v1272_v17 = vld [vmem:[%s1359_s24 + $0x98] sm:$0xff]  ;;  %v1273_v21 = vld [vmem:[%s1359_s24 + $0xa0] sm:$0xff]  ;;  %v1274_v25 = vld [vmem:[%s1359_s24 + $0xa8] sm:$0xff] }
  0x15   : > { %1295 = vmatpush.bf16.msra.mxu2 %v1285_v2  ;;  %1296 = vmatpush.bf16.msra.mxu3 %v1285_v2  ;;  %v1280_v18 = vld [vmem:[%s1359_s24 + $0xd8] sm:$0xff]  ;;  %v1281_v22 = vld [vmem:[%s1359_s24 + $0xe0] sm:$0xff]  ;;  %v1282_v26 = vld [vmem:[%s1359_s24 + $0xe8] sm:$0xff] }
  0x16   : > { %v1259_v27 = vld [vmem:[%s1359_s24 + $0x30] sm:$0xff]  ;;  %v1260_v31 = vld [vmem:[%s1359_s24 + $0x38] sm:$0xff] }
  0x17   : > { %1219 = vmatmul.msk.bf16.vlgmr.msra.gmra.mxu0 %vm427_vm0, %v1253_v3  ;;  %1227 = vmatmul.msk.bf16.vlgmr.msra.gmra.mxu1 %vm427_vm0, %v1261_v4  ;;  %v1267_v28 = vld [vmem:[%s1359_s24 + $0x70] sm:$0xff]  ;;  %v1268_v32 = vld [vmem:[%s1359_s24 + $0x78] sm:$0xff] }
  0x18   : > { %1235 = vmatmul.msk.bf16.vlgmr.msra.gmra.mxu2 %vm427_vm0, %v1269_v5  ;;  %1243 = vmatmul.msk.bf16.vlgmr.msra.gmra.mxu3 %vm427_vm0, %v1277_v6  ;;  %v1275_v29 = vld [vmem:[%s1359_s24 + $0xb0] sm:$0xff]  ;;  %v1276_v33 = vld [vmem:[%s1359_s24 + $0xb8] sm:$0xff] }
  0x19   : > { %v1283_v30 = vld [vmem:[%s1359_s24 + $0xf0] sm:$0xff]  ;;  %v1284_v34 = vld [vmem:[%s1359_s24 + $0xf8] sm:$0xff] }
  0x27   : > { %1220 = vmatmul.msk.bf16.gmra.mxu0 %vm427_vm0, %v1254_v7  ;;  %1228 = vmatmul.msk.bf16.gmra.mxu1 %vm427_vm0, %v1262_v8 }
  0x28   : > { %1236 = vmatmul.msk.bf16.gmra.mxu2 %vm427_vm0, %v1270_v9  ;;  %1244 = vmatmul.msk.bf16.gmra.mxu3 %vm427_vm0, %v1278_v10 }
  0x37   : > { %1221 = vmatmul.msk.bf16.gmra.mxu0 %vm427_vm0, %v1255_v11  ;;  %1229 = vmatmul.msk.bf16.gmra.mxu1 %vm427_vm0, %v1263_v12 }
  0x38   : > { %1237 = vmatmul.msk.bf16.gmra.mxu2 %vm427_vm0, %v1271_v13  ;;  %1245 = vmatmul.msk.bf16.gmra.mxu3 %vm427_vm0, %v1279_v14 }
  0x47   : > { %1222 = vmatmul.msk.bf16.gmra.mxu0 %vm427_vm0, %v1256_v15  ;;  %1230 = vmatmul.msk.bf16.gmra.mxu1 %vm427_vm0, %v1264_v16 }
  0x48   : > { %1238 = vmatmul.msk.bf16.gmra.mxu2 %vm427_vm0, %v1272_v17  ;;  %1246 = vmatmul.msk.bf16.gmra.mxu3 %vm427_vm0, %v1280_v18 }
  0x57   : > { %1223 = vmatmul.msk.bf16.gmra.mxu0 %vm427_vm0, %v1257_v19  ;;  %1231 = vmatmul.msk.bf16.gmra.mxu1 %vm427_vm0, %v1265_v20 }
  0x58   : > { %1239 = vmatmul.msk.bf16.gmra.mxu2 %vm427_vm0, %v1273_v21  ;;  %1247 = vmatmul.msk.bf16.gmra.mxu3 %vm427_vm0, %v1281_v22 }
  0x67   : > { %1224 = vmatmul.msk.bf16.gmra.mxu0 %vm427_vm0, %v1258_v23  ;;  %1232 = vmatmul.msk.bf16.gmra.mxu1 %vm427_vm0, %v1266_v24 }
  0x68   : > { %1240 = vmatmul.msk.bf16.gmra.mxu2 %vm427_vm0, %v1274_v25  ;;  %1248 = vmatmul.msk.bf16.gmra.mxu3 %vm427_vm0, %v1282_v26 }
  0x77   : > { %1225 = vmatmul.msk.bf16.gmra.mxu0 %vm427_vm0, %v1259_v27  ;;  %1233 = vmatmul.msk.bf16.gmra.mxu1 %vm427_vm0, %v1267_v28 }
  0x78   : > { %1241 = vmatmul.msk.bf16.gmra.mxu2 %vm427_vm0, %v1275_v29  ;;  %1249 = vmatmul.msk.bf16.gmra.mxu3 %vm427_vm0, %v1283_v30 }
  0x87   : > { %1226 = vmatmul.msk.bf16.gmra.mxu0 %vm427_vm0, %v1260_v31  ;;  %1234 = vmatmul.msk.bf16.gmra.mxu1 %vm427_vm0, %v1268_v32 }
  0x88   : > { %1242 = vmatmul.msk.bf16.gmra.mxu2 %vm427_vm0, %v1276_v33  ;;  %1250 = vmatmul.msk.bf16.gmra.mxu3 %vm427_vm0, %v1284_v34 }
  0x94   : > { %v533_v36 = vpop.f32.mrf.mxu0  ;;  %v573_v37 = vpop.f32.mrf.mxu1 }
  0x95   : > { %v534_v38 = vadd.f32 %v1428_v35, %v533_v36  ;;  %v574_v39 = vadd.f32 %v1428_v35, %v573_v37 }
  0x97   : > { %vm693_vm1 = vcmp.ge.f32.partialorder %v534_v38, 0.0  ;;  %v757_v40 = vmul.f32 0.2, %v534_v38  ;;  %vm709_vm2 = vcmp.ge.f32.partialorder %v574_v39, 0.0  ;;  %v773_v41 = vmul.f32 0.2, %v574_v39 }
  0x99   : > { %v821_v42 = vsel %vm693_vm1, %v534_v38, %v757_v40  ;;  %v837_v43 = vsel %vm709_vm2, %v574_v39, %v773_v41 }
  0x9a   : > { %v885_v44 = vpack.c.bf16 %v821_v42, %v821_v42  ;;  %v901_v45 = vpack.c.bf16 %v837_v43, %v837_v43 }
  0x9b   : > { %v613_v46 = vpop.f32.mrf.mxu2  ;;  %v653_v47 = vpop.f32.mrf.mxu3 }
  0x9c   : > { %950 = vst.msk [vmem:[%s1437_s29] sm:$0xf] %vm949_vm3, %v885_v44  ;;  %v614_v48 = vadd.f32 %v1428_v35, %v613_v46  ;;  %v654_v49 = vadd.f32 %v1428_v35, %v653_v47  ;;  %v535_v50 = vpop.f32.mrf.mxu0  ;;  %v575_v51 = vpop.f32.mrf.mxu1 }
  0x9d   : > { %966 = vst.msk [vmem:[%s1437_s29 + $0x40] sm:$0xf] %vm949_vm3, %v901_v45  ;;  %v536_v52 = vadd.f32 %v1428_v35, %v535_v50  ;;  %v576_v53 = vadd.f32 %v1428_v35, %v575_v51 }
  0x9e   : > { %vm725_vm4 = vcmp.ge.f32.partialorder %v614_v48, 0.0  ;;  %v789_v54 = vmul.f32 0.2, %v614_v48  ;;  %vm741_vm5 = vcmp.ge.f32.partialorder %v654_v49, 0.0  ;;  %v805_v55 = vmul.f32 0.2, %v654_v49 }
  0x9f   : > { %vm694_vm6 = vcmp.ge.f32.partialorder %v536_v52, 0.0  ;;  %v758_v56 = vmul.f32 0.2, %v536_v52  ;;  %vm710_vm7 = vcmp.ge.f32.partialorder %v576_v53, 0.0  ;;  %v774_v57 = vmul.f32 0.2, %v576_v53 }
  0xa0   : > { %v853_v58 = vsel %vm725_vm4, %v614_v48, %v789_v54  ;;  %v869_v59 = vsel %vm741_vm5, %v654_v49, %v805_v55 }
  0xa1   : > { %v917_v60 = vpack.c.bf16 %v853_v58, %v853_v58  ;;  %v933_v61 = vpack.c.bf16 %v869_v59, %v869_v59  ;;  %v822_v62 = vsel %vm694_vm6, %v536_v52, %v758_v56  ;;  %v838_v63 = vsel %vm710_vm7, %v576_v53, %v774_v57 }
  0xa2   : > { %v886_v0 = vpack.c.bf16 %v822_v62, %v822_v62  ;;  %v902_v1 = vpack.c.bf16 %v838_v63, %v838_v63 }
  0xa3   : > { %982 = vst.msk [vmem:[%s1437_s29 + $0x80] sm:$0xf] %vm949_vm3, %v917_v60  ;;  %v615_v2 = vpop.f32.mrf.mxu2  ;;  %v655_v3 = vpop.f32.mrf.mxu3 }
  0xa4   : > { %998 = vst.msk [vmem:[%s1437_s29 + $0xc0] sm:$0xf] %vm949_vm3, %v933_v61  ;;  %v616_v4 = vadd.f32 %v1428_v35, %v615_v2  ;;  %v656_v5 = vadd.f32 %v1428_v35, %v655_v3  ;;  %v538_v6 = vpop.f32.mrf.mxu0  ;;  %v578_v7 = vpop.f32.mrf.mxu1 }
  0xa5   : > { %951 = vst.msk [vmem:[%s1437_s29 + $0x4] sm:$0xf] %vm949_vm3, %v886_v0  ;;  %v539_v8 = vadd.f32 %v1428_v35, %v538_v6  ;;  %v579_v9 = vadd.f32 %v1428_v35, %v578_v7 }
  0xa6   : > { %967 = vst.msk [vmem:[%s1437_s29 + $0x44] sm:$0xf] %vm949_vm3, %v902_v1  ;;  %vm726_vm8 = vcmp.ge.f32.partialorder %v616_v4, 0.0  ;;  %v790_v10 = vmul.f32 0.2, %v616_v4  ;;  %vm742_vm9 = vcmp.ge.f32.partialorder %v656_v5, 0.0 }
  0xa7   : > { %v806_v11 = vmul.f32 0.2, %v656_v5  ;;  %vm695_vm10 = vcmp.ge.f32.partialorder %v539_v8, 0.0  ;;  %v759_v12 = vmul.f32 0.2, %v539_v8  ;;  %vm711_vm11 = vcmp.ge.f32.partialorder %v579_v9, 0.0 }
  0xa8   : > { %v854_v13 = vsel %vm726_vm8, %v616_v4, %v790_v10  ;;  %v775_v14 = vmul.f32 0.2, %v579_v9 }
  0xa9   : > { %v918_v15 = vpack.c.bf16 %v854_v13, %v854_v13  ;;  %v870_v16 = vsel %vm742_vm9, %v656_v5, %v806_v11  ;;  %v823_v17 = vsel %vm695_vm10, %v539_v8, %v759_v12 }
  0xaa   : > { %v934_v18 = vpack.c.bf16 %v870_v16, %v870_v16  ;;  %v887_v19 = vpack.c.bf16 %v823_v17, %v823_v17  ;;  %v839_v20 = vsel %vm711_vm11, %v579_v9, %v775_v14 }
  0xab   : > { %983 = vst.msk [vmem:[%s1437_s29 + $0x84] sm:$0xf] %vm949_vm3, %v918_v15  ;;  %v903_v21 = vpack.c.bf16 %v839_v20, %v839_v20  ;;  %v618_v22 = vpop.f32.mrf.mxu2  ;;  %v658_v23 = vpop.f32.mrf.mxu3 }
  0xac   : > { %999 = vst.msk [vmem:[%s1437_s29 + $0xc4] sm:$0xf] %vm949_vm3, %v934_v18  ;;  %v619_v24 = vadd.f32 %v1428_v35, %v618_v22  ;;  %v659_v25 = vadd.f32 %v1428_v35, %v658_v23  ;;  %v540_v26 = vpop.f32.mrf.mxu0  ;;  %v580_v27 = vpop.f32.mrf.mxu1 }
  0xad   : > { %952 = vst.msk [vmem:[%s1437_s29 + $0x8] sm:$0xf] %vm949_vm3, %v887_v19  ;;  %v541_v28 = vadd.f32 %v1428_v35, %v540_v26  ;;  %v581_v29 = vadd.f32 %v1428_v35, %v580_v27 }
  0xae   : > { %968 = vst.msk [vmem:[%s1437_s29 + $0x48] sm:$0xf] %vm949_vm3, %v903_v21  ;;  %vm727_vm12 = vcmp.ge.f32.partialorder %v619_v24, 0.0  ;;  %v791_v30 = vmul.f32 0.2, %v619_v24  ;;  %vm743_vm13 = vcmp.ge.f32.partialorder %v659_v25, 0.0 }
  0xaf   : > { %v807_v31 = vmul.f32 0.2, %v659_v25  ;;  %vm696_vm14 = vcmp.ge.f32.partialorder %v541_v28, 0.0  ;;  %v760_v32 = vmul.f32 0.2, %v541_v28  ;;  %vm712_vm15 = vcmp.ge.f32.partialorder %v581_v29, 0.0 }
  0xb0   : > { %v855_v33 = vsel %vm727_vm12, %v619_v24, %v791_v30  ;;  %v776_v34 = vmul.f32 0.2, %v581_v29 }
  0xb1   : > { %v919_v36 = vpack.c.bf16 %v855_v33, %v855_v33  ;;  %v871_v37 = vsel %vm743_vm13, %v659_v25, %v807_v31  ;;  %v824_v38 = vsel %vm696_vm14, %v541_v28, %v760_v32 }
  0xb2   : > { %v935_v39 = vpack.c.bf16 %v871_v37, %v871_v37  ;;  %v888_v40 = vpack.c.bf16 %v824_v38, %v824_v38  ;;  %v840_v41 = vsel %vm712_vm15, %v581_v29, %v776_v34 }
  0xb3   : > { %984 = vst.msk [vmem:[%s1437_s29 + $0x88] sm:$0xf] %vm949_vm3, %v919_v36  ;;  %v904_v42 = vpack.c.bf16 %v840_v41, %v840_v41  ;;  %v620_v43 = vpop.f32.mrf.mxu2  ;;  %v660_v44 = vpop.f32.mrf.mxu3 }
  0xb4   : > { %1000 = vst.msk [vmem:[%s1437_s29 + $0xc8] sm:$0xf] %vm949_vm3, %v935_v39  ;;  %v621_v45 = vadd.f32 %v1428_v35, %v620_v43  ;;  %v661_v46 = vadd.f32 %v1428_v35, %v660_v44  ;;  %v543_v47 = vpop.f32.mrf.mxu0  ;;  %v583_v48 = vpop.f32.mrf.mxu1 }
  0xb5   : > { %953 = vst.msk [vmem:[%s1437_s29 + $0xc] sm:$0xf] %vm949_vm3, %v888_v40  ;;  %v544_v49 = vadd.f32 %v1428_v35, %v543_v47  ;;  %v584_v50 = vadd.f32 %v1428_v35, %v583_v48 }
  0xb6   : > { %969 = vst.msk [vmem:[%s1437_s29 + $0x4c] sm:$0xf] %vm949_vm3, %v904_v42  ;;  %vm728_vm0 = vcmp.ge.f32.partialorder %v621_v45, 0.0  ;;  %v792_v51 = vmul.f32 0.2, %v621_v45  ;;  %vm744_vm1 = vcmp.ge.f32.partialorder %v661_v46, 0.0 }
  0xb7   : > { %v808_v52 = vmul.f32 0.2, %v661_v46  ;;  %vm697_vm2 = vcmp.ge.f32.partialorder %v544_v49, 0.0  ;;  %v761_v53 = vmul.f32 0.2, %v544_v49  ;;  %vm713_vm4 = vcmp.ge.f32.partialorder %v584_v50, 0.0 }
  0xb8   : > { %v856_v54 = vsel %vm728_vm0, %v621_v45, %v792_v51  ;;  %v777_v55 = vmul.f32 0.2, %v584_v50 }
  0xb9   : > { %v920_v56 = vpack.c.bf16 %v856_v54, %v856_v54  ;;  %v872_v57 = vsel %vm744_vm1, %v661_v46, %v808_v52  ;;  %v825_v58 = vsel %vm697_vm2, %v544_v49, %v761_v53 }
  0xba   : > { %v936_v59 = vpack.c.bf16 %v872_v57, %v872_v57  ;;  %v889_v60 = vpack.c.bf16 %v825_v58, %v825_v58  ;;  %v841_v61 = vsel %vm713_vm4, %v584_v50, %v777_v55 }
  0xbb   : > { %985 = vst.msk [vmem:[%s1437_s29 + $0x8c] sm:$0xf] %vm949_vm3, %v920_v56  ;;  %v905_v62 = vpack.c.bf16 %v841_v61, %v841_v61  ;;  %v623_v63 = vpop.f32.mrf.mxu2  ;;  %v663_v0 = vpop.f32.mrf.mxu3 }
  0xbc   : > { %1001 = vst.msk [vmem:[%s1437_s29 + $0xcc] sm:$0xf] %vm949_vm3, %v936_v59  ;;  %v624_v1 = vadd.f32 %v1428_v35, %v623_v63  ;;  %v664_v2 = vadd.f32 %v1428_v35, %v663_v0  ;;  %v545_v3 = vpop.f32.mrf.mxu0  ;;  %v585_v4 = vpop.f32.mrf.mxu1 }
  0xbd   : > { %954 = vst.msk [vmem:[%s1437_s29 + $0x10] sm:$0xf] %vm949_vm3, %v889_v60  ;;  %v546_v5 = vadd.f32 %v1428_v35, %v545_v3  ;;  %v586_v6 = vadd.f32 %v1428_v35, %v585_v4 }
  0xbe   : > { %970 = vst.msk [vmem:[%s1437_s29 + $0x50] sm:$0xf] %vm949_vm3, %v905_v62  ;;  %vm729_vm5 = vcmp.ge.f32.partialorder %v624_v1, 0.0  ;;  %v793_v7 = vmul.f32 0.2, %v624_v1  ;;  %vm745_vm6 = vcmp.ge.f32.partialorder %v664_v2, 0.0 }
  0xbf   : > { %v809_v8 = vmul.f32 0.2, %v664_v2  ;;  %vm698_vm7 = vcmp.ge.f32.partialorder %v546_v5, 0.0  ;;  %v762_v9 = vmul.f32 0.2, %v546_v5  ;;  %vm714_vm8 = vcmp.ge.f32.partialorder %v586_v6, 0.0 }
  0xc0   : > { %v857_v10 = vsel %vm729_vm5, %v624_v1, %v793_v7  ;;  %v778_v11 = vmul.f32 0.2, %v586_v6 }
  0xc1   : > { %v921_v12 = vpack.c.bf16 %v857_v10, %v857_v10  ;;  %v873_v13 = vsel %vm745_vm6, %v664_v2, %v809_v8  ;;  %v826_v14 = vsel %vm698_vm7, %v546_v5, %v762_v9 }
  0xc2   : > { %v937_v15 = vpack.c.bf16 %v873_v13, %v873_v13  ;;  %v890_v16 = vpack.c.bf16 %v826_v14, %v826_v14  ;;  %v842_v17 = vsel %vm714_vm8, %v586_v6, %v778_v11 }
  0xc3   : > { %986 = vst.msk [vmem:[%s1437_s29 + $0x90] sm:$0xf] %vm949_vm3, %v921_v12  ;;  %v906_v18 = vpack.c.bf16 %v842_v17, %v842_v17  ;;  %v625_v19 = vpop.f32.mrf.mxu2  ;;  %v665_v20 = vpop.f32.mrf.mxu3 }
  0xc4   : > { %1002 = vst.msk [vmem:[%s1437_s29 + $0xd0] sm:$0xf] %vm949_vm3, %v937_v15  ;;  %v626_v21 = vadd.f32 %v1428_v35, %v625_v19  ;;  %v666_v22 = vadd.f32 %v1428_v35, %v665_v20  ;;  %v548_v23 = vpop.f32.mrf.mxu0  ;;  %v588_v24 = vpop.f32.mrf.mxu1 }
  0xc5   : > { %955 = vst.msk [vmem:[%s1437_s29 + $0x14] sm:$0xf] %vm949_vm3, %v890_v16  ;;  %v549_v25 = vadd.f32 %v1428_v35, %v548_v23  ;;  %v589_v26 = vadd.f32 %v1428_v35, %v588_v24 }
  0xc6   : > { %971 = vst.msk [vmem:[%s1437_s29 + $0x54] sm:$0xf] %vm949_vm3, %v906_v18  ;;  %vm730_vm9 = vcmp.ge.f32.partialorder %v626_v21, 0.0  ;;  %v794_v27 = vmul.f32 0.2, %v626_v21  ;;  %vm746_vm10 = vcmp.ge.f32.partialorder %v666_v22, 0.0 }
  0xc7   : > { %v810_v28 = vmul.f32 0.2, %v666_v22  ;;  %vm699_vm11 = vcmp.ge.f32.partialorder %v549_v25, 0.0  ;;  %v763_v29 = vmul.f32 0.2, %v549_v25  ;;  %vm715_vm12 = vcmp.ge.f32.partialorder %v589_v26, 0.0 }
  0xc8   : > { %v858_v30 = vsel %vm730_vm9, %v626_v21, %v794_v27  ;;  %v779_v31 = vmul.f32 0.2, %v589_v26 }
  0xc9   : > { %v922_v32 = vpack.c.bf16 %v858_v30, %v858_v30  ;;  %v874_v33 = vsel %vm746_vm10, %v666_v22, %v810_v28  ;;  %v827_v34 = vsel %vm699_vm11, %v549_v25, %v763_v29 }
  0xca   : > { %v938_v36 = vpack.c.bf16 %v874_v33, %v874_v33  ;;  %v891_v37 = vpack.c.bf16 %v827_v34, %v827_v34  ;;  %v843_v38 = vsel %vm715_vm12, %v589_v26, %v779_v31 }
  0xcb   : > { %987 = vst.msk [vmem:[%s1437_s29 + $0x94] sm:$0xf] %vm949_vm3, %v922_v32  ;;  %v907_v39 = vpack.c.bf16 %v843_v38, %v843_v38  ;;  %v628_v40 = vpop.f32.mrf.mxu2  ;;  %v668_v41 = vpop.f32.mrf.mxu3 }
  0xcc   : > { %1003 = vst.msk [vmem:[%s1437_s29 + $0xd4] sm:$0xf] %vm949_vm3, %v938_v36  ;;  %v629_v42 = vadd.f32 %v1428_v35, %v628_v40  ;;  %v669_v43 = vadd.f32 %v1428_v35, %v668_v41  ;;  %v550_v44 = vpop.f32.mrf.mxu0  ;;  %v590_v45 = vpop.f32.mrf.mxu1 }
  0xcd   : > { %956 = vst.msk [vmem:[%s1437_s29 + $0x18] sm:$0xf] %vm949_vm3, %v891_v37  ;;  %v551_v46 = vadd.f32 %v1428_v35, %v550_v44  ;;  %v591_v47 = vadd.f32 %v1428_v35, %v590_v45 }
  0xce   : > { %972 = vst.msk [vmem:[%s1437_s29 + $0x58] sm:$0xf] %vm949_vm3, %v907_v39  ;;  %vm731_vm13 = vcmp.ge.f32.partialorder %v629_v42, 0.0  ;;  %v795_v48 = vmul.f32 0.2, %v629_v42  ;;  %vm747_vm14 = vcmp.ge.f32.partialorder %v669_v43, 0.0 }
  0xcf   : > { %v811_v49 = vmul.f32 0.2, %v669_v43  ;;  %vm700_vm15 = vcmp.ge.f32.partialorder %v551_v46, 0.0  ;;  %v764_v50 = vmul.f32 0.2, %v551_v46  ;;  %vm716_vm0 = vcmp.ge.f32.partialorder %v591_v47, 0.0 }
  0xd0   : > { %v859_v51 = vsel %vm731_vm13, %v629_v42, %v795_v48  ;;  %v780_v52 = vmul.f32 0.2, %v591_v47 }
  0xd1   : > { %v923_v53 = vpack.c.bf16 %v859_v51, %v859_v51  ;;  %v875_v54 = vsel %vm747_vm14, %v669_v43, %v811_v49  ;;  %v828_v55 = vsel %vm700_vm15, %v551_v46, %v764_v50 }
  0xd2   : > { %v939_v56 = vpack.c.bf16 %v875_v54, %v875_v54  ;;  %v892_v57 = vpack.c.bf16 %v828_v55, %v828_v55  ;;  %v844_v58 = vsel %vm716_vm0, %v591_v47, %v780_v52 }
  0xd3   : > { %988 = vst.msk [vmem:[%s1437_s29 + $0x98] sm:$0xf] %vm949_vm3, %v923_v53  ;;  %v908_v59 = vpack.c.bf16 %v844_v58, %v844_v58  ;;  %v630_v60 = vpop.f32.mrf.mxu2  ;;  %v670_v61 = vpop.f32.mrf.mxu3 }
  0xd4   : > { %1004 = vst.msk [vmem:[%s1437_s29 + $0xd8] sm:$0xf] %vm949_vm3, %v939_v56  ;;  %v631_v62 = vadd.f32 %v1428_v35, %v630_v60  ;;  %v671_v63 = vadd.f32 %v1428_v35, %v670_v61  ;;  %v553_v0 = vpop.f32.mrf.mxu0  ;;  %v593_v1 = vpop.f32.mrf.mxu1 }
  0xd5   : > { %957 = vst.msk [vmem:[%s1437_s29 + $0x1c] sm:$0xf] %vm949_vm3, %v892_v57  ;;  %v554_v2 = vadd.f32 %v1428_v35, %v553_v0  ;;  %v594_v3 = vadd.f32 %v1428_v35, %v593_v1 }
  0xd6   : > { %973 = vst.msk [vmem:[%s1437_s29 + $0x5c] sm:$0xf] %vm949_vm3, %v908_v59  ;;  %vm732_vm1 = vcmp.ge.f32.partialorder %v631_v62, 0.0  ;;  %v796_v4 = vmul.f32 0.2, %v631_v62  ;;  %vm748_vm2 = vcmp.ge.f32.partialorder %v671_v63, 0.0 }
  0xd7   : > { %v812_v5 = vmul.f32 0.2, %v671_v63  ;;  %vm701_vm4 = vcmp.ge.f32.partialorder %v554_v2, 0.0  ;;  %v765_v6 = vmul.f32 0.2, %v554_v2  ;;  %vm717_vm5 = vcmp.ge.f32.partialorder %v594_v3, 0.0 }
  0xd8   : > { %v860_v7 = vsel %vm732_vm1, %v631_v62, %v796_v4  ;;  %v781_v8 = vmul.f32 0.2, %v594_v3 }
  0xd9   : > { %v924_v9 = vpack.c.bf16 %v860_v7, %v860_v7  ;;  %v876_v10 = vsel %vm748_vm2, %v671_v63, %v812_v5  ;;  %v829_v11 = vsel %vm701_vm4, %v554_v2, %v765_v6 }
  0xda   : > { %v940_v12 = vpack.c.bf16 %v876_v10, %v876_v10  ;;  %v893_v13 = vpack.c.bf16 %v829_v11, %v829_v11  ;;  %v845_v14 = vsel %vm717_vm5, %v594_v3, %v781_v8 }
  0xdb   : > { %989 = vst.msk [vmem:[%s1437_s29 + $0x9c] sm:$0xf] %vm949_vm3, %v924_v9  ;;  %v909_v15 = vpack.c.bf16 %v845_v14, %v845_v14  ;;  %v633_v16 = vpop.f32.mrf.mxu2  ;;  %v673_v17 = vpop.f32.mrf.mxu3 }
  0xdc   : > { %1005 = vst.msk [vmem:[%s1437_s29 + $0xdc] sm:$0xf] %vm949_vm3, %v940_v12  ;;  %v634_v18 = vadd.f32 %v1428_v35, %v633_v16  ;;  %v674_v19 = vadd.f32 %v1428_v35, %v673_v17  ;;  %v555_v20 = vpop.f32.mrf.mxu0  ;;  %v595_v21 = vpop.f32.mrf.mxu1 }
  0xdd   : > { %958 = vst.msk [vmem:[%s1437_s29 + $0x20] sm:$0xf] %vm949_vm3, %v893_v13  ;;  %v556_v22 = vadd.f32 %v1428_v35, %v555_v20  ;;  %v596_v23 = vadd.f32 %v1428_v35, %v595_v21 }
  0xde   : > { %974 = vst.msk [vmem:[%s1437_s29 + $0x60] sm:$0xf] %vm949_vm3, %v909_v15  ;;  %vm733_vm6 = vcmp.ge.f32.partialorder %v634_v18, 0.0  ;;  %v797_v24 = vmul.f32 0.2, %v634_v18  ;;  %vm749_vm7 = vcmp.ge.f32.partialorder %v674_v19, 0.0 }
  0xdf   : > { %v813_v25 = vmul.f32 0.2, %v674_v19  ;;  %vm702_vm8 = vcmp.ge.f32.partialorder %v556_v22, 0.0  ;;  %v766_v26 = vmul.f32 0.2, %v556_v22  ;;  %vm718_vm9 = vcmp.ge.f32.partialorder %v596_v23, 0.0 }
  0xe0   : > { %v861_v27 = vsel %vm733_vm6, %v634_v18, %v797_v24  ;;  %v782_v28 = vmul.f32 0.2, %v596_v23 }
  0xe1   : > { %v925_v29 = vpack.c.bf16 %v861_v27, %v861_v27  ;;  %v877_v30 = vsel %vm749_vm7, %v674_v19, %v813_v25  ;;  %v830_v31 = vsel %vm702_vm8, %v556_v22, %v766_v26 }
  0xe2   : > { %v941_v32 = vpack.c.bf16 %v877_v30, %v877_v30  ;;  %v894_v33 = vpack.c.bf16 %v830_v31, %v830_v31  ;;  %v846_v34 = vsel %vm718_vm9, %v596_v23, %v782_v28 }
  0xe3   : > { %990 = vst.msk [vmem:[%s1437_s29 + $0xa0] sm:$0xf] %vm949_vm3, %v925_v29  ;;  %v910_v36 = vpack.c.bf16 %v846_v34, %v846_v34  ;;  %v635_v37 = vpop.f32.mrf.mxu2  ;;  %v675_v38 = vpop.f32.mrf.mxu3 }
  0xe4   : > { %1006 = vst.msk [vmem:[%s1437_s29 + $0xe0] sm:$0xf] %vm949_vm3, %v941_v32  ;;  %v636_v39 = vadd.f32 %v1428_v35, %v635_v37  ;;  %v676_v40 = vadd.f32 %v1428_v35, %v675_v38  ;;  %v558_v41 = vpop.f32.mrf.mxu0  ;;  %v598_v42 = vpop.f32.mrf.mxu1 }
  0xe5   : > { %959 = vst.msk [vmem:[%s1437_s29 + $0x24] sm:$0xf] %vm949_vm3, %v894_v33  ;;  %v559_v43 = vadd.f32 %v1428_v35, %v558_v41  ;;  %v599_v44 = vadd.f32 %v1428_v35, %v598_v42 }
  0xe6   : > { %975 = vst.msk [vmem:[%s1437_s29 + $0x64] sm:$0xf] %vm949_vm3, %v910_v36  ;;  %vm734_vm10 = vcmp.ge.f32.partialorder %v636_v39, 0.0  ;;  %v798_v45 = vmul.f32 0.2, %v636_v39  ;;  %vm750_vm11 = vcmp.ge.f32.partialorder %v676_v40, 0.0 }
  0xe7   : > { %v814_v46 = vmul.f32 0.2, %v676_v40  ;;  %vm703_vm12 = vcmp.ge.f32.partialorder %v559_v43, 0.0  ;;  %v767_v47 = vmul.f32 0.2, %v559_v43  ;;  %vm719_vm13 = vcmp.ge.f32.partialorder %v599_v44, 0.0 }
  0xe8   : > { %v862_v48 = vsel %vm734_vm10, %v636_v39, %v798_v45  ;;  %v783_v49 = vmul.f32 0.2, %v599_v44 }
  0xe9   : > { %v926_v50 = vpack.c.bf16 %v862_v48, %v862_v48  ;;  %v878_v51 = vsel %vm750_vm11, %v676_v40, %v814_v46  ;;  %v831_v52 = vsel %vm703_vm12, %v559_v43, %v767_v47 }
  0xea   : > { %v942_v53 = vpack.c.bf16 %v878_v51, %v878_v51  ;;  %v895_v54 = vpack.c.bf16 %v831_v52, %v831_v52  ;;  %v847_v55 = vsel %vm719_vm13, %v599_v44, %v783_v49 }
  0xeb   : > { %991 = vst.msk [vmem:[%s1437_s29 + $0xa4] sm:$0xf] %vm949_vm3, %v926_v50  ;;  %v911_v56 = vpack.c.bf16 %v847_v55, %v847_v55  ;;  %v638_v57 = vpop.f32.mrf.mxu2  ;;  %v678_v58 = vpop.f32.mrf.mxu3 }
  0xec   : > { %1007 = vst.msk [vmem:[%s1437_s29 + $0xe4] sm:$0xf] %vm949_vm3, %v942_v53  ;;  %v639_v59 = vadd.f32 %v1428_v35, %v638_v57  ;;  %v679_v60 = vadd.f32 %v1428_v35, %v678_v58  ;;  %v560_v61 = vpop.f32.mrf.mxu0  ;;  %v600_v62 = vpop.f32.mrf.mxu1 }
  0xed   : > { %960 = vst.msk [vmem:[%s1437_s29 + $0x28] sm:$0xf] %vm949_vm3, %v895_v54  ;;  %v561_v63 = vadd.f32 %v1428_v35, %v560_v61  ;;  %v601_v0 = vadd.f32 %v1428_v35, %v600_v62 }
  0xee   : > { %976 = vst.msk [vmem:[%s1437_s29 + $0x68] sm:$0xf] %vm949_vm3, %v911_v56  ;;  %vm735_vm14 = vcmp.ge.f32.partialorder %v639_v59, 0.0  ;;  %v799_v1 = vmul.f32 0.2, %v639_v59  ;;  %vm751_vm15 = vcmp.ge.f32.partialorder %v679_v60, 0.0 }
  0xef   : > { %v815_v2 = vmul.f32 0.2, %v679_v60  ;;  %vm704_vm0 = vcmp.ge.f32.partialorder %v561_v63, 0.0  ;;  %v768_v3 = vmul.f32 0.2, %v561_v63  ;;  %vm720_vm1 = vcmp.ge.f32.partialorder %v601_v0, 0.0 }
  0xf0   : > { %v863_v4 = vsel %vm735_vm14, %v639_v59, %v799_v1  ;;  %v784_v5 = vmul.f32 0.2, %v601_v0 }
  0xf1   : > { %v927_v6 = vpack.c.bf16 %v863_v4, %v863_v4  ;;  %v879_v7 = vsel %vm751_vm15, %v679_v60, %v815_v2  ;;  %v832_v8 = vsel %vm704_vm0, %v561_v63, %v768_v3 }
  0xf2   : > { %v943_v9 = vpack.c.bf16 %v879_v7, %v879_v7  ;;  %v896_v10 = vpack.c.bf16 %v832_v8, %v832_v8  ;;  %v848_v11 = vsel %vm720_vm1, %v601_v0, %v784_v5 }
  0xf3   : > { %992 = vst.msk [vmem:[%s1437_s29 + $0xa8] sm:$0xf] %vm949_vm3, %v927_v6  ;;  %v912_v12 = vpack.c.bf16 %v848_v11, %v848_v11  ;;  %v640_v13 = vpop.f32.mrf.mxu2  ;;  %v680_v14 = vpop.f32.mrf.mxu3 }
  0xf4   : > { %1008 = vst.msk [vmem:[%s1437_s29 + $0xe8] sm:$0xf] %vm949_vm3, %v943_v9  ;;  %v641_v15 = vadd.f32 %v1428_v35, %v640_v13  ;;  %v681_v16 = vadd.f32 %v1428_v35, %v680_v14  ;;  %v563_v17 = vpop.f32.mrf.mxu0  ;;  %v603_v18 = vpop.f32.mrf.mxu1 }
  0xf5   : > { %961 = vst.msk [vmem:[%s1437_s29 + $0x2c] sm:$0xf] %vm949_vm3, %v896_v10  ;;  %v564_v19 = vadd.f32 %v1428_v35, %v563_v17  ;;  %v604_v20 = vadd.f32 %v1428_v35, %v603_v18 }
  0xf6   : > { %977 = vst.msk [vmem:[%s1437_s29 + $0x6c] sm:$0xf] %vm949_vm3, %v912_v12  ;;  %vm736_vm2 = vcmp.ge.f32.partialorder %v641_v15, 0.0  ;;  %v800_v21 = vmul.f32 0.2, %v641_v15  ;;  %vm752_vm4 = vcmp.ge.f32.partialorder %v681_v16, 0.0 }
  0xf7   : > { %v816_v22 = vmul.f32 0.2, %v681_v16  ;;  %vm705_vm5 = vcmp.ge.f32.partialorder %v564_v19, 0.0  ;;  %v769_v23 = vmul.f32 0.2, %v564_v19  ;;  %vm721_vm6 = vcmp.ge.f32.partialorder %v604_v20, 0.0 }
  0xf8   : > { %v864_v24 = vsel %vm736_vm2, %v641_v15, %v800_v21  ;;  %v785_v25 = vmul.f32 0.2, %v604_v20 }
  0xf9   : > { %v928_v26 = vpack.c.bf16 %v864_v24, %v864_v24  ;;  %v880_v27 = vsel %vm752_vm4, %v681_v16, %v816_v22  ;;  %v833_v28 = vsel %vm705_vm5, %v564_v19, %v769_v23 }
  0xfa   : > { %v944_v29 = vpack.c.bf16 %v880_v27, %v880_v27  ;;  %v897_v30 = vpack.c.bf16 %v833_v28, %v833_v28  ;;  %v849_v31 = vsel %vm721_vm6, %v604_v20, %v785_v25 }
  0xfb   : > { %993 = vst.msk [vmem:[%s1437_s29 + $0xac] sm:$0xf] %vm949_vm3, %v928_v26  ;;  %v913_v32 = vpack.c.bf16 %v849_v31, %v849_v31  ;;  %v643_v33 = vpop.f32.mrf.mxu2  ;;  %v683_v34 = vpop.f32.mrf.mxu3 }
  0xfc   : > { %1009 = vst.msk [vmem:[%s1437_s29 + $0xec] sm:$0xf] %vm949_vm3, %v944_v29  ;;  %v644_v36 = vadd.f32 %v1428_v35, %v643_v33  ;;  %v684_v37 = vadd.f32 %v1428_v35, %v683_v34  ;;  %v565_v38 = vpop.f32.mrf.mxu0  ;;  %v605_v39 = vpop.f32.mrf.mxu1 }
  0xfd   : > { %962 = vst.msk [vmem:[%s1437_s29 + $0x30] sm:$0xf] %vm949_vm3, %v897_v30  ;;  %v566_v40 = vadd.f32 %v1428_v35, %v565_v38  ;;  %v606_v41 = vadd.f32 %v1428_v35, %v605_v39 }
  0xfe   : > { %978 = vst.msk [vmem:[%s1437_s29 + $0x70] sm:$0xf] %vm949_vm3, %v913_v32  ;;  %vm737_vm7 = vcmp.ge.f32.partialorder %v644_v36, 0.0  ;;  %v801_v42 = vmul.f32 0.2, %v644_v36  ;;  %vm753_vm8 = vcmp.ge.f32.partialorder %v684_v37, 0.0 }
  0xff   : > { %v817_v43 = vmul.f32 0.2, %v684_v37  ;;  %vm706_vm9 = vcmp.ge.f32.partialorder %v566_v40, 0.0  ;;  %v770_v44 = vmul.f32 0.2, %v566_v40  ;;  %vm722_vm10 = vcmp.ge.f32.partialorder %v606_v41, 0.0 }
 0x100   : > { %v865_v45 = vsel %vm737_vm7, %v644_v36, %v801_v42  ;;  %v786_v46 = vmul.f32 0.2, %v606_v41 }
 0x101   : > { %v929_v47 = vpack.c.bf16 %v865_v45, %v865_v45  ;;  %v881_v48 = vsel %vm753_vm8, %v684_v37, %v817_v43  ;;  %v834_v49 = vsel %vm706_vm9, %v566_v40, %v770_v44 }
 0x102   : > { %v945_v50 = vpack.c.bf16 %v881_v48, %v881_v48  ;;  %v898_v51 = vpack.c.bf16 %v834_v49, %v834_v49  ;;  %v850_v52 = vsel %vm722_vm10, %v606_v41, %v786_v46 }
 0x103   : > { %994 = vst.msk [vmem:[%s1437_s29 + $0xb0] sm:$0xf] %vm949_vm3, %v929_v47  ;;  %v914_v53 = vpack.c.bf16 %v850_v52, %v850_v52  ;;  %v645_v54 = vpop.f32.mrf.mxu2  ;;  %v685_v55 = vpop.f32.mrf.mxu3 }
 0x104   : > { %1010 = vst.msk [vmem:[%s1437_s29 + $0xf0] sm:$0xf] %vm949_vm3, %v945_v50  ;;  %v646_v56 = vadd.f32 %v1428_v35, %v645_v54  ;;  %v686_v57 = vadd.f32 %v1428_v35, %v685_v55  ;;  %v568_v58 = vpop.f32.mrf.mxu0  ;;  %v608_v59 = vpop.f32.mrf.mxu1 }
 0x105   : > { %963 = vst.msk [vmem:[%s1437_s29 + $0x34] sm:$0xf] %vm949_vm3, %v898_v51  ;;  %v569_v60 = vadd.f32 %v1428_v35, %v568_v58  ;;  %v609_v61 = vadd.f32 %v1428_v35, %v608_v59 }
 0x106   : > { %979 = vst.msk [vmem:[%s1437_s29 + $0x74] sm:$0xf] %vm949_vm3, %v914_v53  ;;  %vm738_vm11 = vcmp.ge.f32.partialorder %v646_v56, 0.0  ;;  %v802_v62 = vmul.f32 0.2, %v646_v56  ;;  %vm754_vm12 = vcmp.ge.f32.partialorder %v686_v57, 0.0 }
 0x107   : > { %v818_v63 = vmul.f32 0.2, %v686_v57  ;;  %vm707_vm13 = vcmp.ge.f32.partialorder %v569_v60, 0.0  ;;  %v771_v0 = vmul.f32 0.2, %v569_v60  ;;  %vm723_vm14 = vcmp.ge.f32.partialorder %v609_v61, 0.0 }
 0x108   : > { %v866_v1 = vsel %vm738_vm11, %v646_v56, %v802_v62  ;;  %v787_v2 = vmul.f32 0.2, %v609_v61 }
 0x109   : > { %v930_v3 = vpack.c.bf16 %v866_v1, %v866_v1  ;;  %v882_v4 = vsel %vm754_vm12, %v686_v57, %v818_v63  ;;  %v835_v5 = vsel %vm707_vm13, %v569_v60, %v771_v0 }
 0x10a   : > { %v946_v6 = vpack.c.bf16 %v882_v4, %v882_v4  ;;  %v899_v7 = vpack.c.bf16 %v835_v5, %v835_v5  ;;  %v851_v8 = vsel %vm723_vm14, %v609_v61, %v787_v2 }
 0x10b   : > { %995 = vst.msk [vmem:[%s1437_s29 + $0xb4] sm:$0xf] %vm949_vm3, %v930_v3  ;;  %v915_v9 = vpack.c.bf16 %v851_v8, %v851_v8  ;;  %v648_v10 = vpop.f32.mrf.mxu2  ;;  %v688_v11 = vpop.f32.mrf.mxu3 }
 0x10c   : > { %1011 = vst.msk [vmem:[%s1437_s29 + $0xf4] sm:$0xf] %vm949_vm3, %v946_v6  ;;  %v649_v12 = vadd.f32 %v1428_v35, %v648_v10  ;;  %v689_v13 = vadd.f32 %v1428_v35, %v688_v11  ;;  %v570_v14 = vpop.f32.mrf.mxu0  ;;  %v610_v15 = vpop.f32.mrf.mxu1 }
 0x10d   : > { %964 = vst.msk [vmem:[%s1437_s29 + $0x38] sm:$0xf] %vm949_vm3, %v899_v7  ;;  %v571_v16 = vadd.f32 %v1428_v35, %v570_v14  ;;  %v611_v17 = vadd.f32 %v1428_v35, %v610_v15 }
 0x10e   : > { %980 = vst.msk [vmem:[%s1437_s29 + $0x78] sm:$0xf] %vm949_vm3, %v915_v9  ;;  %vm739_vm15 = vcmp.ge.f32.partialorder %v649_v12, 0.0  ;;  %v803_v18 = vmul.f32 0.2, %v649_v12  ;;  %vm755_vm0 = vcmp.ge.f32.partialorder %v689_v13, 0.0 }
 0x10f   : > { %v819_v19 = vmul.f32 0.2, %v689_v13  ;;  %vm708_vm1 = vcmp.ge.f32.partialorder %v571_v16, 0.0  ;;  %v772_v20 = vmul.f32 0.2, %v571_v16  ;;  %vm724_vm2 = vcmp.ge.f32.partialorder %v611_v17, 0.0 }
 0x110   : > { %v867_v21 = vsel %vm739_vm15, %v649_v12, %v803_v18  ;;  %v788_v22 = vmul.f32 0.2, %v611_v17 }
 0x111   : > { %v931_v23 = vpack.c.bf16 %v867_v21, %v867_v21  ;;  %v883_v24 = vsel %vm755_vm0, %v689_v13, %v819_v19  ;;  %v836_v25 = vsel %vm708_vm1, %v571_v16, %v772_v20 }
 0x112   : > { %v947_v26 = vpack.c.bf16 %v883_v24, %v883_v24  ;;  %v900_v27 = vpack.c.bf16 %v836_v25, %v836_v25  ;;  %v852_v28 = vsel %vm724_vm2, %v611_v17, %v788_v22 }
 0x113   : > { %996 = vst.msk [vmem:[%s1437_s29 + $0xb8] sm:$0xf] %vm949_vm3, %v931_v23  ;;  %v916_v29 = vpack.c.bf16 %v852_v28, %v852_v28  ;;  %v650_v30 = vpop.f32.mrf.mxu2  ;;  %v690_v31 = vpop.f32.mrf.mxu3 }
 0x114   : > { %1012 = vst.msk [vmem:[%s1437_s29 + $0xf8] sm:$0xf] %vm949_vm3, %v947_v26  ;;  %v651_v32 = vadd.f32 %v1428_v35, %v650_v30  ;;  %v691_v33 = vadd.f32 %v1428_v35, %v690_v31 }
 0x115   : > { %965 = vst.msk [vmem:[%s1437_s29 + $0x3c] sm:$0xf] %vm949_vm3, %v900_v27 }
 0x116   : > { %981 = vst.msk [vmem:[%s1437_s29 + $0x7c] sm:$0xf] %vm949_vm3, %v916_v29  ;;  %vm740_vm4 = vcmp.ge.f32.partialorder %v651_v32, 0.0  ;;  %v804_v34 = vmul.f32 0.2, %v651_v32  ;;  %vm756_vm5 = vcmp.ge.f32.partialorder %v691_v33, 0.0 }
 0x117   : > { %v820_v36 = vmul.f32 0.2, %v691_v33 }
 0x118   : > { %v868_v37 = vsel %vm740_vm4, %v651_v32, %v804_v34 }
 0x119   : > { %v932_v38 = vpack.c.bf16 %v868_v37, %v868_v37  ;;  %v884_v39 = vsel %vm756_vm5, %v691_v33, %v820_v36 }
 0x11a   : > { %v948_v40 = vpack.c.bf16 %v884_v39, %v884_v39 }
 0x11b   : > { %997 = vst.msk [vmem:[%s1437_s29 + $0xbc] sm:$0xf] %vm949_vm3, %v932_v38 }
 0x11c   : > { %1013 = vst.msk [vmem:[%s1437_s29 + $0xfc] sm:$0xf] %vm949_vm3, %v948_v40 }
 0x11d PF: > { %s13_s12 = sadd.s32 1, %s1312_s12  }
 0x11e   : > { %p10_p4 = scmp.ge.s32.totalorder %s13_s12, 6  }
 0x120   :  { %12 = sbr.rel (!%p10_p4) target bundleno = 1 (0x1), region = 62 }

// kernel: discriminator_forward.7
= control target key start
LH: loop header
LB: loop body
LE: loop exit
PB: predicated region body
PF: predicated region fallthrough
CT: control target
= control target key end

     0   :  { %s868_s12 = smov 0   ;;  %s1037_s0 = inlined_call_operand.vmem [shape: bf16[512,128], index: 0, kind: input, shape index: {}]   ;;  %s1038_s1 = inlined_call_operand.vmem [shape: bf16[128,16], index: 1, kind: input, shape index: {}]   ;;  %s1039_s2 = inlined_call_operand.vmem [shape: f32[1,16], index: 2, kind: input, shape index: {}]   ;;  %s1040_s3 = inlined_call_operand.vmem [shape: bf16[512,16], index: 3, kind: output, shape index: {}]  }
   0x1 LB: > { %s676_s13 = sadd.s32 4294967295, %s846_s12   ;;  %p680_p0 = scmp.ge.s32.totalorder %s846_s12, 1  ;;  %s846_s12 = sphi %s868_s12, %s13_s12  }
   0x2   : > { %p138_p1 = scmp.lt.s32.totalorder %s846_s12, 3 }
   0x4   : > { %p139_p2 = pnand %p680_p0, %p138_p1 }
   0x5   : > { %s681_s22 = sshll.u32 (!%p139_p2), %s676_s13, 5 }
   0x6   : > { %142 = sbr.rel (%p139_p2) target bundleno = 241 (0xf1), region = 32  ;;  %p163_p3 = scmp.lt.s32.totalorder (!%p139_p2), %s681_s22, 63 }
   0xb   : > { %v806_v0 = vld [vmem:[%s1038_s1 + $0x38] sm:$0xff]  ;;  %v805_v1 = vld [vmem:[%s1038_s1 + $0x30] sm:$0xff]  ;;  %v804_v2 = vld [vmem:[%s1038_s1 + $0x28] sm:$0xff]  ;;  %s1042_s22 = smov (!%p163_p3, %s681_s22), 63  ;;  %vm587_vm2 = vcmask 125952  }
   0xc   : > { %370 = vmatpush.bf16.msra.mxu0 %v806_v0  ;;  %807 = vmatpush.bf16.msra.mxu1 %v806_v0  ;;  %v803_v3 = vld [vmem:[%s1038_s1 + $0x20] sm:$0xff]  ;;  %v802_v4 = vld [vmem:[%s1038_s1 + $0x18] sm:$0xff]  ;;  %v801_v5 = vld [vmem:[%s1038_s1 + $0x10] sm:$0xff]  ;;  %s682_s29 = sshll.u32 %s1042_s22, 2 }
   0xd   : > { %808 = vmatpush.bf16.msra.mxu2 %v806_v0  ;;  %809 = vmatpush.bf16.msra.mxu3 %v806_v0  ;;  %v800_v6 = vld [vmem:[%s1038_s1 + $0x8] sm:$0xff]  ;;  %v799_v7 = vld [vmem:[%s1038_s1] sm:$0xff]  ;;  %s908_s7 = scalar_lea.vmem %s1037_s0, %s682_s29  ;;  %s938_s13 = scalar_lea.vmem %s1040_s3, %s682_s29 }
   0xe   : > { %v783_v8 = vld [vmem:[%s908_s7] sm:$0xff]  ;;  %v784_v12 = vld [vmem:[%s908_s7 + $0x8] sm:$0xff]  ;;  %v785_v16 = vld [vmem:[%s908_s7 + $0x10] sm:$0xff] }
   0xf   : > { %v787_v9 = vld [vmem:[%s908_s7 + $0x20] sm:$0xff]  ;;  %v788_v13 = vld [vmem:[%s908_s7 + $0x28] sm:$0xff]  ;;  %v789_v17 = vld [vmem:[%s908_s7 + $0x30] sm:$0xff] }
  0x10   : > { %371 = vmatpush.bf16.msra.mxu0 %v805_v1  ;;  %810 = vmatpush.bf16.msra.mxu1 %v805_v1  ;;  %v791_v10 = vld [vmem:[%s908_s7 + $0x40] sm:$0xff]  ;;  %v792_v14 = vld [vmem:[%s908_s7 + $0x48] sm:$0xff]  ;;  %v793_v18 = vld [vmem:[%s908_s7 + $0x50] sm:$0xff] }
  0x11   : > { %811 = vmatpush.bf16.msra.mxu2 %v805_v1  ;;  %812 = vmatpush.bf16.msra.mxu3 %v805_v1  ;;  %v795_v11 = vld [vmem:[%s908_s7 + $0x60] sm:$0xff]  ;;  %v796_v15 = vld [vmem:[%s908_s7 + $0x68] sm:$0xff]  ;;  %v797_v19 = vld [vmem:[%s908_s7 + $0x70] sm:$0xff] }
  0x12   : > { %v786_v20 = vld [vmem:[%s908_s7 + $0x18] sm:$0xff]  ;;  %v929_v24 = vld [vmem:[%s1039_s2] ss:$0 sm:$0xff] }
  0x13   : > { %v790_v21 = vld [vmem:[%s908_s7 + $0x38] sm:$0xff] }
  0x14   : > { %372 = vmatpush.bf16.msra.mxu0 %v804_v2  ;;  %813 = vmatpush.bf16.msra.mxu1 %v804_v2  ;;  %v794_v22 = vld [vmem:[%s908_s7 + $0x58] sm:$0xff] }
  0x15   : > { %814 = vmatpush.bf16.msra.mxu2 %v804_v2  ;;  %815 = vmatpush.bf16.msra.mxu3 %v804_v2  ;;  %v798_v23 = vld [vmem:[%s908_s7 + $0x78] sm:$0xff] }
  0x18   : > { %373 = vmatpush.bf16.msra.mxu0 %v803_v3  ;;  %816 = vmatpush.bf16.msra.mxu1 %v803_v3 }
  0x19   : > { %817 = vmatpush.bf16.msra.mxu2 %v803_v3  ;;  %818 = vmatpush.bf16.msra.mxu3 %v803_v3 }
  0x1c   : > { %374 = vmatpush.bf16.msra.mxu0 %v802_v4  ;;  %819 = vmatpush.bf16.msra.mxu1 %v802_v4 }
  0x1d   : > { %820 = vmatpush.bf16.msra.mxu2 %v802_v4  ;;  %821 = vmatpush.bf16.msra.mxu3 %v802_v4 }
  0x20   : > { %375 = vmatpush.bf16.msra.mxu0 %v801_v5  ;;  %822 = vmatpush.bf16.msra.mxu1 %v801_v5 }
  0x21   : > { %823 = vmatpush.bf16.msra.mxu2 %v801_v5  ;;  %824 = vmatpush.bf16.msra.mxu3 %v801_v5 }
  0x24   : > { %376 = vmatpush.bf16.msra.mxu0 %v800_v6  ;;  %825 = vmatpush.bf16.msra.mxu1 %v800_v6 }
  0x25   : > { %826 = vmatpush.bf16.msra.mxu2 %v800_v6  ;;  %827 = vmatpush.bf16.msra.mxu3 %v800_v6 }
  0x28   : > { %377 = vmatpush.bf16.msra.mxu0 %v799_v7  ;;  %828 = vmatpush.bf16.msra.mxu1 %v799_v7 }
  0x29   : > { %829 = vmatpush.bf16.msra.mxu2 %v799_v7  ;;  %830 = vmatpush.bf16.msra.mxu3 %v799_v7 }
  0x2b   : > { %378 = vmatmul.bf16.vlgmr.msra.gmra.mxu0 %v783_v8  ;;  %398 = vmatmul.bf16.vlgmr.msra.gmra.mxu1 %v787_v9 }
  0x2c   : > { %418 = vmatmul.bf16.vlgmr.msra.gmra.mxu2 %v791_v10  ;;  %438 = vmatmul.bf16.vlgmr.msra.gmra.mxu3 %v795_v11 }
  0x3b   : > { %383 = vmatmul.bf16.gmra.mxu0 %v784_v12  ;;  %403 = vmatmul.bf16.gmra.mxu1 %v788_v13 }
  0x3c   : > { %423 = vmatmul.bf16.gmra.mxu2 %v792_v14  ;;  %443 = vmatmul.bf16.gmra.mxu3 %v796_v15 }
  0x4b   : > { %388 = vmatmul.bf16.gmra.mxu0 %v785_v16  ;;  %408 = vmatmul.bf16.gmra.mxu1 %v789_v17 }
  0x4c   : > { %428 = vmatmul.bf16.gmra.mxu2 %v793_v18  ;;  %448 = vmatmul.bf16.gmra.mxu3 %v797_v19 }
  0x5b   : > { %393 = vmatmul.bf16.gmra.mxu0 %v786_v20  ;;  %413 = vmatmul.bf16.gmra.mxu1 %v790_v21 }
  0x5c   : > { %433 = vmatmul.bf16.gmra.mxu2 %v794_v22  ;;  %453 = vmatmul.bf16.gmra.mxu3 %v798_v23 }
  0xa8   : > { %v379_v25 = vpop.f32.mrf.mxu0  ;;  %v399_v26 = vpop.f32.mrf.mxu1 }
  0xa9   : > { %v380_v27 = vadd.f32 %v929_v24, %v379_v25  ;;  %v400_v28 = vadd.f32 %v929_v24, %v399_v26 }
  0xab   : > { %vm459_vm0 = vcmp.ge.f32.partialorder %v380_v27, 0.0  ;;  %v491_v29 = vmul.f32 0.2, %v380_v27  ;;  %vm467_vm1 = vcmp.ge.f32.partialorder %v400_v28, 0.0  ;;  %v499_v30 = vmul.f32 0.2, %v400_v28 }
  0xad   : > { %v523_v31 = vsel %vm459_vm0, %v380_v27, %v491_v29  ;;  %v531_v32 = vsel %vm467_vm1, %v400_v28, %v499_v30 }
  0xae   : > { %v555_v33 = vpack.c.bf16 %v523_v31, %v523_v31  ;;  %v563_v34 = vpack.c.bf16 %v531_v32, %v531_v32 }
  0xaf   : > { %v419_v35 = vpop.f32.mrf.mxu2  ;;  %v439_v36 = vpop.f32.mrf.mxu3 }
  0xb0   : > { %588 = vst.msk [vmem:[%s938_s13] sm:$0xf] %vm587_vm2, %v555_v33  ;;  %v420_v37 = vadd.f32 %v929_v24, %v419_v35  ;;  %v440_v38 = vadd.f32 %v929_v24, %v439_v36  ;;  %v381_v39 = vpop.f32.mrf.mxu0  ;;  %v401_v40 = vpop.f32.mrf.mxu1 }
  0xb1   : > { %596 = vst.msk [vmem:[%s938_s13 + $0x20] sm:$0xf] %vm587_vm2, %v563_v34  ;;  %v382_v41 = vadd.f32 %v929_v24, %v381_v39  ;;  %v402_v42 = vadd.f32 %v929_v24, %v401_v40 }
  0xb2   : > { %vm475_vm3 = vcmp.ge.f32.partialorder %v420_v37, 0.0  ;;  %v507_v43 = vmul.f32 0.2, %v420_v37  ;;  %vm483_vm4 = vcmp.ge.f32.partialorder %v440_v38, 0.0  ;;  %v515_v44 = vmul.f32 0.2, %v440_v38 }
  0xb3   : > { %vm460_vm5 = vcmp.ge.f32.partialorder %v382_v41, 0.0  ;;  %v492_v45 = vmul.f32 0.2, %v382_v41  ;;  %vm468_vm6 = vcmp.ge.f32.partialorder %v402_v42, 0.0  ;;  %v500_v46 = vmul.f32 0.2, %v402_v42 }
  0xb4   : > { %v539_v47 = vsel %vm475_vm3, %v420_v37, %v507_v43  ;;  %v547_v48 = vsel %vm483_vm4, %v440_v38, %v515_v44 }
  0xb5   : > { %v571_v49 = vpack.c.bf16 %v539_v47, %v539_v47  ;;  %v579_v50 = vpack.c.bf16 %v547_v48, %v547_v48  ;;  %v524_v51 = vsel %vm460_vm5, %v382_v41, %v492_v45  ;;  %v532_v52 = vsel %vm468_vm6, %v402_v42, %v500_v46 }
  0xb6   : > { %v556_v53 = vpack.c.bf16 %v524_v51, %v524_v51  ;;  %v564_v54 = vpack.c.bf16 %v532_v52, %v532_v52 }
  0xb7   : > { %604 = vst.msk [vmem:[%s938_s13 + $0x40] sm:$0xf] %vm587_vm2, %v571_v49  ;;  %v421_v55 = vpop.f32.mrf.mxu2  ;;  %v441_v56 = vpop.f32.mrf.mxu3 }
  0xb8   : > { %612 = vst.msk [vmem:[%s938_s13 + $0x60] sm:$0xf] %vm587_vm2, %v579_v50  ;;  %v422_v57 = vadd.f32 %v929_v24, %v421_v55  ;;  %v442_v58 = vadd.f32 %v929_v24, %v441_v56  ;;  %v384_v59 = vpop.f32.mrf.mxu0  ;;  %v404_v60 = vpop.f32.mrf.mxu1 }
  0xb9   : > { %589 = vst.msk [vmem:[%s938_s13 + $0x4] sm:$0xf] %vm587_vm2, %v556_v53  ;;  %v385_v61 = vadd.f32 %v929_v24, %v384_v59  ;;  %v405_v62 = vadd.f32 %v929_v24, %v404_v60 }
  0xba   : > { %597 = vst.msk [vmem:[%s938_s13 + $0x24] sm:$0xf] %vm587_vm2, %v564_v54  ;;  %vm476_vm7 = vcmp.ge.f32.partialorder %v422_v57, 0.0  ;;  %v508_v63 = vmul.f32 0.2, %v422_v57  ;;  %vm484_vm8 = vcmp.ge.f32.partialorder %v442_v58, 0.0 }
  0xbb   : > { %v516_v0 = vmul.f32 0.2, %v442_v58  ;;  %vm461_vm9 = vcmp.ge.f32.partialorder %v385_v61, 0.0  ;;  %v493_v1 = vmul.f32 0.2, %v385_v61  ;;  %vm469_vm10 = vcmp.ge.f32.partialorder %v405_v62, 0.0 }
  0xbc   : > { %v540_v2 = vsel %vm476_vm7, %v422_v57, %v508_v63  ;;  %v501_v3 = vmul.f32 0.2, %v405_v62 }
  0xbd   : > { %v572_v4 = vpack.c.bf16 %v540_v2, %v540_v2  ;;  %v548_v5 = vsel %vm484_vm8, %v442_v58, %v516_v0  ;;  %v525_v6 = vsel %vm461_vm9, %v385_v61, %v493_v1 }
  0xbe   : > { %v580_v7 = vpack.c.bf16 %v548_v5, %v548_v5  ;;  %v557_v8 = vpack.c.bf16 %v525_v6, %v525_v6  ;;  %v533_v9 = vsel %vm469_vm10, %v405_v62, %v501_v3 }
  0xbf   : > { %605 = vst.msk [vmem:[%s938_s13 + $0x44] sm:$0xf] %vm587_vm2, %v572_v4  ;;  %v565_v10 = vpack.c.bf16 %v533_v9, %v533_v9  ;;  %v424_v11 = vpop.f32.mrf.mxu2  ;;  %v444_v12 = vpop.f32.mrf.mxu3 }
  0xc0   : > { %613 = vst.msk [vmem:[%s938_s13 + $0x64] sm:$0xf] %vm587_vm2, %v580_v7  ;;  %v425_v13 = vadd.f32 %v929_v24, %v424_v11  ;;  %v445_v14 = vadd.f32 %v929_v24, %v444_v12  ;;  %v386_v15 = vpop.f32.mrf.mxu0  ;;  %v406_v16 = vpop.f32.mrf.mxu1 }
  0xc1   : > { %590 = vst.msk [vmem:[%s938_s13 + $0x8] sm:$0xf] %vm587_vm2, %v557_v8  ;;  %v387_v17 = vadd.f32 %v929_v24, %v386_v15  ;;  %v407_v18 = vadd.f32 %v929_v24, %v406_v16 }
  0xc2   : > { %598 = vst.msk [vmem:[%s938_s13 + $0x28] sm:$0xf] %vm587_vm2, %v565_v10  ;;  %vm477_vm11 = vcmp.ge.f32.partialorder %v425_v13, 0.0  ;;  %v509_v19 = vmul.f32 0.2, %v425_v13  ;;  %vm485_vm12 = vcmp.ge.f32.partialorder %v445_v14, 0.0 }
  0xc3   : > { %v517_v20 = vmul.f32 0.2, %v445_v14  ;;  %vm462_vm13 = vcmp.ge.f32.partialorder %v387_v17, 0.0  ;;  %v494_v21 = vmul.f32 0.2, %v387_v17  ;;  %vm470_vm14 = vcmp.ge.f32.partialorder %v407_v18, 0.0 }
  0xc4   : > { %v541_v22 = vsel %vm477_vm11, %v425_v13, %v509_v19  ;;  %v502_v23 = vmul.f32 0.2, %v407_v18 }
  0xc5   : > { %v573_v25 = vpack.c.bf16 %v541_v22, %v541_v22  ;;  %v549_v26 = vsel %vm485_vm12, %v445_v14, %v517_v20  ;;  %v526_v27 = vsel %vm462_vm13, %v387_v17, %v494_v21 }
  0xc6   : > { %v581_v28 = vpack.c.bf16 %v549_v26, %v549_v26  ;;  %v558_v29 = vpack.c.bf16 %v526_v27, %v526_v27  ;;  %v534_v30 = vsel %vm470_vm14, %v407_v18, %v502_v23 }
  0xc7   : > { %606 = vst.msk [vmem:[%s938_s13 + $0x48] sm:$0xf] %vm587_vm2, %v573_v25  ;;  %v566_v31 = vpack.c.bf16 %v534_v30, %v534_v30  ;;  %v426_v32 = vpop.f32.mrf.mxu2  ;;  %v446_v33 = vpop.f32.mrf.mxu3 }
  0xc8   : > { %614 = vst.msk [vmem:[%s938_s13 + $0x68] sm:$0xf] %vm587_vm2, %v581_v28  ;;  %v427_v34 = vadd.f32 %v929_v24, %v426_v32  ;;  %v447_v35 = vadd.f32 %v929_v24, %v446_v33  ;;  %v389_v36 = vpop.f32.mrf.mxu0  ;;  %v409_v37 = vpop.f32.mrf.mxu1 }
  0xc9   : > { %591 = vst.msk [vmem:[%s938_s13 + $0xc] sm:$0xf] %vm587_vm2, %v558_v29  ;;  %v390_v38 = vadd.f32 %v929_v24, %v389_v36  ;;  %v410_v39 = vadd.f32 %v929_v24, %v409_v37 }
  0xca   : > { %599 = vst.msk [vmem:[%s938_s13 + $0x2c] sm:$0xf] %vm587_vm2, %v566_v31  ;;  %vm478_vm15 = vcmp.ge.f32.partialorder %v427_v34, 0.0  ;;  %v510_v40 = vmul.f32 0.2, %v427_v34  ;;  %vm486_vm0 = vcmp.ge.f32.partialorder %v447_v35, 0.0 }
  0xcb   : > { %v518_v41 = vmul.f32 0.2, %v447_v35  ;;  %vm463_vm1 = vcmp.ge.f32.partialorder %v390_v38, 0.0  ;;  %v495_v42 = vmul.f32 0.2, %v390_v38  ;;  %vm471_vm3 = vcmp.ge.f32.partialorder %v410_v39, 0.0 }
  0xcc   : > { %v542_v43 = vsel %vm478_vm15, %v427_v34, %v510_v40  ;;  %v503_v44 = vmul.f32 0.2, %v410_v39 }
  0xcd   : > { %v574_v45 = vpack.c.bf16 %v542_v43, %v542_v43  ;;  %v550_v46 = vsel %vm486_vm0, %v447_v35, %v518_v41  ;;  %v527_v47 = vsel %vm463_vm1, %v390_v38, %v495_v42 }
  0xce   : > { %v582_v48 = vpack.c.bf16 %v550_v46, %v550_v46  ;;  %v559_v49 = vpack.c.bf16 %v527_v47, %v527_v47  ;;  %v535_v50 = vsel %vm471_vm3, %v410_v39, %v503_v44 }
  0xcf   : > { %607 = vst.msk [vmem:[%s938_s13 + $0x4c] sm:$0xf] %vm587_vm2, %v574_v45  ;;  %v567_v51 = vpack.c.bf16 %v535_v50, %v535_v50  ;;  %v429_v52 = vpop.f32.mrf.mxu2  ;;  %v449_v53 = vpop.f32.mrf.mxu3 }
  0xd0   : > { %615 = vst.msk [vmem:[%s938_s13 + $0x6c] sm:$0xf] %vm587_vm2, %v582_v48  ;;  %v430_v54 = vadd.f32 %v929_v24, %v429_v52  ;;  %v450_v55 = vadd.f32 %v929_v24, %v449_v53  ;;  %v391_v56 = vpop.f32.mrf.mxu0  ;;  %v411_v57 = vpop.f32.mrf.mxu1 }
  0xd1   : > { %592 = vst.msk [vmem:[%s938_s13 + $0x10] sm:$0xf] %vm587_vm2, %v559_v49  ;;  %v392_v58 = vadd.f32 %v929_v24, %v391_v56  ;;  %v412_v59 = vadd.f32 %v929_v24, %v411_v57 }
  0xd2   : > { %600 = vst.msk [vmem:[%s938_s13 + $0x30] sm:$0xf] %vm587_vm2, %v567_v51  ;;  %vm479_vm4 = vcmp.ge.f32.partialorder %v430_v54, 0.0  ;;  %v511_v60 = vmul.f32 0.2, %v430_v54  ;;  %vm487_vm5 = vcmp.ge.f32.partialorder %v450_v55, 0.0 }
  0xd3   : > { %v519_v61 = vmul.f32 0.2, %v450_v55  ;;  %vm464_vm6 = vcmp.ge.f32.partialorder %v392_v58, 0.0  ;;  %v496_v62 = vmul.f32 0.2, %v392_v58  ;;  %vm472_vm7 = vcmp.ge.f32.partialorder %v412_v59, 0.0 }
  0xd4   : > { %v543_v63 = vsel %vm479_vm4, %v430_v54, %v511_v60  ;;  %v504_v0 = vmul.f32 0.2, %v412_v59 }
  0xd5   : > { %v575_v1 = vpack.c.bf16 %v543_v63, %v543_v63  ;;  %v551_v2 = vsel %vm487_vm5, %v450_v55, %v519_v61  ;;  %v528_v3 = vsel %vm464_vm6, %v392_v58, %v496_v62 }
  0xd6   : > { %v583_v4 = vpack.c.bf16 %v551_v2, %v551_v2  ;;  %v560_v5 = vpack.c.bf16 %v528_v3, %v528_v3  ;;  %v536_v6 = vsel %vm472_vm7, %v412_v59, %v504_v0 }
  0xd7   : > { %608 = vst.msk [vmem:[%s938_s13 + $0x50] sm:$0xf] %vm587_vm2, %v575_v1  ;;  %v568_v7 = vpack.c.bf16 %v536_v6, %v536_v6  ;;  %v431_v8 = vpop.f32.mrf.mxu2  ;;  %v451_v9 = vpop.f32.mrf.mxu3 }
  0xd8   : > { %616 = vst.msk [vmem:[%s938_s13 + $0x70] sm:$0xf] %vm587_vm2, %v583_v4  ;;  %v432_v10 = vadd.f32 %v929_v24, %v431_v8  ;;  %v452_v11 = vadd.f32 %v929_v24, %v451_v9  ;;  %v394_v12 = vpop.f32.mrf.mxu0  ;;  %v414_v13 = vpop.f32.mrf.mxu1 }
  0xd9   : > { %593 = vst.msk [vmem:[%s938_s13 + $0x14] sm:$0xf] %vm587_vm2, %v560_v5  ;;  %v395_v14 = vadd.f32 %v929_v24, %v394_v12  ;;  %v415_v15 = vadd.f32 %v929_v24, %v414_v13 }
  0xda   : > { %601 = vst.msk [vmem:[%s938_s13 + $0x34] sm:$0xf] %vm587_vm2, %v568_v7  ;;  %vm480_vm8 = vcmp.ge.f32.partialorder %v432_v10, 0.0  ;;  %v512_v16 = vmul.f32 0.2, %v432_v10  ;;  %vm488_vm9 = vcmp.ge.f32.partialorder %v452_v11, 0.0 }
  0xdb   : > { %v520_v17 = vmul.f32 0.2, %v452_v11  ;;  %vm465_vm10 = vcmp.ge.f32.partialorder %v395_v14, 0.0  ;;  %v497_v18 = vmul.f32 0.2, %v395_v14  ;;  %vm473_vm11 = vcmp.ge.f32.partialorder %v415_v15, 0.0 }
  0xdc   : > { %v544_v19 = vsel %vm480_vm8, %v432_v10, %v512_v16  ;;  %v505_v20 = vmul.f32 0.2, %v415_v15 }
  0xdd   : > { %v576_v21 = vpack.c.bf16 %v544_v19, %v544_v19  ;;  %v552_v22 = vsel %vm488_vm9, %v452_v11, %v520_v17  ;;  %v529_v23 = vsel %vm465_vm10, %v395_v14, %v497_v18 }
  0xde   : > { %v584_v25 = vpack.c.bf16 %v552_v22, %v552_v22  ;;  %v561_v26 = vpack.c.bf16 %v529_v23, %v529_v23  ;;  %v537_v27 = vsel %vm473_vm11, %v415_v15, %v505_v20 }
  0xdf   : > { %609 = vst.msk [vmem:[%s938_s13 + $0x54] sm:$0xf] %vm587_vm2, %v576_v21  ;;  %v569_v28 = vpack.c.bf16 %v537_v27, %v537_v27  ;;  %v434_v29 = vpop.f32.mrf.mxu2  ;;  %v454_v30 = vpop.f32.mrf.mxu3 }
  0xe0   : > { %617 = vst.msk [vmem:[%s938_s13 + $0x74] sm:$0xf] %vm587_vm2, %v584_v25  ;;  %v435_v31 = vadd.f32 %v929_v24, %v434_v29  ;;  %v455_v32 = vadd.f32 %v929_v24, %v454_v30  ;;  %v396_v33 = vpop.f32.mrf.mxu0  ;;  %v416_v34 = vpop.f32.mrf.mxu1 }
  0xe1   : > { %594 = vst.msk [vmem:[%s938_s13 + $0x18] sm:$0xf] %vm587_vm2, %v561_v26  ;;  %v397_v35 = vadd.f32 %v929_v24, %v396_v33  ;;  %v417_v36 = vadd.f32 %v929_v24, %v416_v34 }
  0xe2   : > { %602 = vst.msk [vmem:[%s938_s13 + $0x38] sm:$0xf] %vm587_vm2, %v569_v28  ;;  %vm481_vm12 = vcmp.ge.f32.partialorder %v435_v31, 0.0  ;;  %v513_v37 = vmul.f32 0.2, %v435_v31  ;;  %vm489_vm13 = vcmp.ge.f32.partialorder %v455_v32, 0.0 }
  0xe3   : > { %v521_v38 = vmul.f32 0.2, %v455_v32  ;;  %vm466_vm14 = vcmp.ge.f32.partialorder %v397_v35, 0.0  ;;  %v498_v39 = vmul.f32 0.2, %v397_v35  ;;  %vm474_vm15 = vcmp.ge.f32.partialorder %v417_v36, 0.0 }
  0xe4   : > { %v545_v40 = vsel %vm481_vm12, %v435_v31, %v513_v37  ;;  %v506_v41 = vmul.f32 0.2, %v417_v36 }
  0xe5   : > { %v577_v42 = vpack.c.bf16 %v545_v40, %v545_v40  ;;  %v553_v43 = vsel %vm489_vm13, %v455_v32, %v521_v38  ;;  %v530_v44 = vsel %vm466_vm14, %v397_v35, %v498_v39 }
  0xe6   : > { %v585_v45 = vpack.c.bf16 %v553_v43, %v553_v43  ;;  %v562_v46 = vpack.c.bf16 %v530_v44, %v530_v44  ;;  %v538_v47 = vsel %vm474_vm15, %v417_v36, %v506_v41 }
  0xe7   : > { %610 = vst.msk [vmem:[%s938_s13 + $0x58] sm:$0xf] %vm587_vm2, %v577_v42  ;;  %v570_v48 = vpack.c.bf16 %v538_v47, %v538_v47  ;;  %v436_v49 = vpop.f32.mrf.mxu2  ;;  %v456_v50 = vpop.f32.mrf.mxu3 }
  0xe8   : > { %618 = vst.msk [vmem:[%s938_s13 + $0x78] sm:$0xf] %vm587_vm2, %v585_v45  ;;  %v437_v51 = vadd.f32 %v929_v24, %v436_v49  ;;  %v457_v52 = vadd.f32 %v929_v24, %v456_v50 }
  0xe9   : > { %595 = vst.msk [vmem:[%s938_s13 + $0x1c] sm:$0xf] %vm587_vm2, %v562_v46 }
  0xea   : > { %603 = vst.msk [vmem:[%s938_s13 + $0x3c] sm:$0xf] %vm587_vm2, %v570_v48  ;;  %vm482_vm0 = vcmp.ge.f32.partialorder %v437_v51, 0.0  ;;  %v514_v53 = vmul.f32 0.2, %v437_v51  ;;  %vm490_vm1 = vcmp.ge.f32.partialorder %v457_v52, 0.0 }
  0xeb   : > { %v522_v54 = vmul.f32 0.2, %v457_v52 }
  0xec   : > { %v546_v55 = vsel %vm482_vm0, %v437_v51, %v514_v53 }
  0xed   : > { %v578_v56 = vpack.c.bf16 %v546_v55, %v546_v55  ;;  %v554_v57 = vsel %vm490_vm1, %v457_v52, %v522_v54 }
  0xee   : > { %v586_v58 = vpack.c.bf16 %v554_v57, %v554_v57 }
  0xef   : > { %611 = vst.msk [vmem:[%s938_s13 + $0x5c] sm:$0xf] %vm587_vm2, %v578_v56 }
  0xf0   : > { %619 = vst.msk [vmem:[%s938_s13 + $0x7c] sm:$0xf] %vm587_vm2, %v586_v58 }
  0xf1 PF: > { %s13_s12 = sadd.s32 1, %s846_s12  }
  0xf2   : > { %p10_p4 = scmp.ge.s32.totalorder %s13_s12, 4  }
  0xf4   :  { %12 = sbr.rel (!%p10_p4) target bundleno = 1 (0x1), region = 62 }

// kernel: discriminator_forward.8
= control target key start
LH: loop header
LB: loop body
LE: loop exit
PB: predicated region body
PF: predicated region fallthrough
CT: control target
= control target key end

     0   :  { %s698_s12 = smov 0   ;;  %s816_s0 = inlined_call_operand.vmem [shape: bf16[128,256], index: 0, kind: input, shape index: {}]   ;;  %s817_s1 = inlined_call_operand.vmem [shape: bf16[256,32], index: 1, kind: input, shape index: {}]   ;;  %s818_s2 = inlined_call_operand.vmem [shape: f32[1,32], index: 2, kind: input, shape index: {}]   ;;  %s819_s3 = inlined_call_operand.vmem [shape: bf16[128,32], index: 3, kind: output, shape index: {}]  }
   0x1 LB: > { %s512_s13 = sadd.s32 4294967295, %s676_s12   ;;  %p516_p0 = scmp.ge.s32.totalorder %s676_s12, 1  ;;  %s676_s12 = sphi %s698_s12, %s13_s12  }
   0x2   : > { %p139_p1 = scmp.lt.s32.totalorder %s676_s12, 3 }
   0x4   : > { %p140_p2 = pnand %p516_p0, %p139_p1 }
   0x5   : > { %s517_s26 = sshll.u32 (!%p140_p2), %s512_s13, 3 }
   0x6   : > { %143 = sbr.rel (%p140_p2) target bundleno = 209 (0xd1), region = 32  ;;  %p165_p3 = scmp.lt.s32.totalorder (!%p140_p2), %s517_s26, 15 }
   0xb   : > { %v636_v0 = vld [vmem:[%s817_s1 + $0x38] sm:$0xff]  ;;  %v635_v2 = vld [vmem:[%s817_s1 + $0x30] sm:$0xff]  ;;  %v634_v4 = vld [vmem:[%s817_s1 + $0x28] sm:$0xff]  ;;  %s821_s26 = smov (!%p165_p3, %s517_s26), 15  ;;  %vm447_vm1 = vcmask 257024  }
   0xc   : > { %v644_v1 = vld [vmem:[%s817_s1 + $0x78] sm:$0xff]  ;;  %357 = vmatpush.bf16.msra.mxu0 %v636_v0  ;;  %645 = vmatpush.bf16.msra.mxu2 %v636_v0  ;;  %v643_v3 = vld [vmem:[%s817_s1 + $0x70] sm:$0xff]  ;;  %v642_v5 = vld [vmem:[%s817_s1 + $0x68] sm:$0xff]  ;;  %s620_s13 = sshll.u32 %s821_s26, 3  ;;  %s521_s28 = sshll.u32 %s821_s26, 2 }
   0xd   : > { %386 = vmatpush.bf16.msra.mxu1 %v644_v1  ;;  %653 = vmatpush.bf16.msra.mxu3 %v644_v1  ;;  %v633_v6 = vld [vmem:[%s817_s1 + $0x20] sm:$0xff]  ;;  %v632_v8 = vld [vmem:[%s817_s1 + $0x18] sm:$0xff]  ;;  %v631_v10 = vld [vmem:[%s817_s1 + $0x10] sm:$0xff]  ;;  %s751_s18 = scalar_lea.vmem %s816_s0, %s620_s13  ;;  %s788_s4 = scalar_lea.vmem %s819_s3, %s521_s28 }
   0xe   : > { %v641_v7 = vld [vmem:[%s817_s1 + $0x60] sm:$0xff]  ;;  %v640_v9 = vld [vmem:[%s817_s1 + $0x58] sm:$0xff]  ;;  %v639_v11 = vld [vmem:[%s817_s1 + $0x50] sm:$0xff] }
   0xf   : > { %v630_v12 = vld [vmem:[%s817_s1 + $0x8] sm:$0xff]  ;;  %v629_v14 = vld [vmem:[%s817_s1] sm:$0xff]  ;;  %v532_v28 = vld [vmem:[%s751_s18 + $0x10] sm:$0xf] }
  0x10   : > { %358 = vmatpush.bf16.msra.mxu0 %v635_v2  ;;  %646 = vmatpush.bf16.msra.mxu2 %v635_v2  ;;  %v638_v13 = vld [vmem:[%s817_s1 + $0x48] sm:$0xff]  ;;  %v637_v15 = vld [vmem:[%s817_s1 + $0x40] sm:$0xff]  ;;  %v624_v29 = vld [vmem:[%s751_s18 + $0x14] sm:$0xf0] }
  0x11   : > { %387 = vmatpush.bf16.msra.mxu1 %v643_v3  ;;  %654 = vmatpush.bf16.msra.mxu3 %v643_v3  ;;  %v524_v16 = vld [vmem:[%s751_s18] sm:$0xf]  ;;  %v622_v17 = vld [vmem:[%s751_s18 + $0x4] sm:$0xf0]  ;;  %v621_v20 = vld [vmem:[%s751_s18 + $0x4] sm:$0xf]  ;;  %v533_v36 = vor.u32 %v624_v29, %v532_v28 }
  0x12   : > { %v540_v18 = vld [vmem:[%s751_s18 + $0x20] sm:$0xf]  ;;  %v626_v19 = vld [vmem:[%s751_s18 + $0x24] sm:$0xf0]  ;;  %v526_v21 = vld [vmem:[%s751_s18 + $0x8] sm:$0xf0]  ;;  %v525_v24 = vor.u32 %v622_v17, %v524_v16 }
  0x13   : > { %v625_v22 = vld [vmem:[%s751_s18 + $0x24] sm:$0xf]  ;;  %v542_v23 = vld [vmem:[%s751_s18 + $0x28] sm:$0xf0]  ;;  %v541_v25 = vor.u32 %v626_v19, %v540_v18  ;;  %v529_v26 = vor.u32 %v621_v20, %v526_v21  ;;  %v548_v30 = vld [vmem:[%s751_s18 + $0x30] sm:$0xf] }
  0x14   : > { %359 = vmatpush.bf16.msra.mxu0 %v634_v4  ;;  %647 = vmatpush.bf16.msra.mxu2 %v634_v4  ;;  %v545_v27 = vor.u32 %v625_v22, %v542_v23  ;;  %v628_v31 = vld [vmem:[%s751_s18 + $0x34] sm:$0xf0]  ;;  %v623_v32 = vld [vmem:[%s751_s18 + $0x14] sm:$0xf]  ;;  %v534_v33 = vld [vmem:[%s751_s18 + $0x18] sm:$0xf0] }
  0x15   : > { %388 = vmatpush.bf16.msra.mxu1 %v642_v5  ;;  %655 = vmatpush.bf16.msra.mxu3 %v642_v5  ;;  %v627_v34 = vld [vmem:[%s751_s18 + $0x34] sm:$0xf]  ;;  %v550_v35 = vld [vmem:[%s751_s18 + $0x38] sm:$0xf0]  ;;  %v549_v37 = vor.u32 %v628_v31, %v548_v30  ;;  %v537_v38 = vor.u32 %v623_v32, %v534_v33  ;;  %v781_v40 = vld [vmem:[%s818_s2] ss:$0 sm:$0xff] }
  0x16   : > { %v553_v39 = vor.u32 %v627_v34, %v550_v35 }
  0x18   : > { %360 = vmatpush.bf16.msra.mxu0 %v633_v6  ;;  %648 = vmatpush.bf16.msra.mxu2 %v633_v6 }
  0x19   : > { %389 = vmatpush.bf16.msra.mxu1 %v641_v7  ;;  %656 = vmatpush.bf16.msra.mxu3 %v641_v7 }
  0x1c   : > { %361 = vmatpush.bf16.msra.mxu0 %v632_v8  ;;  %649 = vmatpush.bf16.msra.mxu2 %v632_v8 }
  0x1d   : > { %390 = vmatpush.bf16.msra.mxu1 %v640_v9  ;;  %657 = vmatpush.bf16.msra.mxu3 %v640_v9 }
  0x20   : > { %362 = vmatpush.bf16.msra.mxu0 %v631_v10  ;;  %650 = vmatpush.bf16.msra.mxu2 %v631_v10 }
  0x21   : > { %391 = vmatpush.bf16.msra.mxu1 %v639_v11  ;;  %658 = vmatpush.bf16.msra.mxu3 %v639_v11 }
  0x24   : > { %363 = vmatpush.bf16.msra.mxu0 %v630_v12  ;;  %651 = vmatpush.bf16.msra.mxu2 %v630_v12 }
  0x25   : > { %392 = vmatpush.bf16.msra.mxu1 %v638_v13  ;;  %659 = vmatpush.bf16.msra.mxu3 %v638_v13 }
  0x28   : > { %364 = vmatpush.bf16.msra.mxu0 %v629_v14  ;;  %652 = vmatpush.bf16.msra.mxu2 %v629_v14 }
  0x29   : > { %393 = vmatpush.bf16.msra.mxu1 %v637_v15  ;;  %660 = vmatpush.bf16.msra.mxu3 %v637_v15 }
  0x2b   : > { %365 = vmatmul.bf16.vlgmr.msra.gmra.mxu0 %v525_v24  ;;  %375 = vmatmul.bf16.vlgmr.msra.gmra.mxu2 %v541_v25 }
  0x2c   : > { %394 = vmatmul.bf16.vlgmr.msra.gmra.mxu1 %v529_v26  ;;  %404 = vmatmul.bf16.vlgmr.msra.gmra.mxu3 %v545_v27 }
  0x3b   : > { %370 = vmatmul.bf16.gmra.mxu0 %v533_v36  ;;  %380 = vmatmul.bf16.gmra.mxu2 %v549_v37 }
  0x3c   : > { %399 = vmatmul.bf16.gmra.mxu1 %v537_v38  ;;  %409 = vmatmul.bf16.gmra.mxu3 %v553_v39 }
  0xa8   : > { %v366_v41 = vpop.f32.mrf.mxu0 }
  0xa9   : > { %v367_v42 = vadd.f32 %v781_v40, %v366_v41  ;;  %v395_v43 = vpop.f32.mrf.mxu1 }
  0xab   : > { %v396_v44 = vadd.f32 %v395_v43, %v367_v42 }
  0xad   : > { %vm415_vm0 = vcmp.ge.f32.partialorder %v396_v44, 0.0  ;;  %v423_v45 = vmul.f32 0.2, %v396_v44 }
  0xae   : > { %v376_v46 = vpop.f32.mrf.mxu2 }
  0xaf   : > { %v431_v47 = vsel %vm415_vm0, %v396_v44, %v423_v45  ;;  %v377_v48 = vadd.f32 %v781_v40, %v376_v46  ;;  %v405_v49 = vpop.f32.mrf.mxu3 }
  0xb0   : > { %v439_v50 = vpack.c.bf16 %v431_v47, %v431_v47  ;;  %v368_v51 = vpop.f32.mrf.mxu0 }
  0xb1   : > { %v406_v52 = vadd.f32 %v405_v49, %v377_v48  ;;  %v369_v53 = vadd.f32 %v781_v40, %v368_v51  ;;  %v397_v54 = vpop.f32.mrf.mxu1 }
  0xb2   : > { %448 = vst.msk [vmem:[%s788_s4] sm:$0xf] %vm447_vm1, %v439_v50 }
  0xb3   : > { %vm419_vm2 = vcmp.ge.f32.partialorder %v406_v52, 0.0  ;;  %v427_v55 = vmul.f32 0.2, %v406_v52  ;;  %v398_v56 = vadd.f32 %v397_v54, %v369_v53 }
  0xb5   : > { %v435_v57 = vsel %vm419_vm2, %v406_v52, %v427_v55  ;;  %vm416_vm3 = vcmp.ge.f32.partialorder %v398_v56, 0.0  ;;  %v424_v58 = vmul.f32 0.2, %v398_v56 }
  0xb6   : > { %v443_v59 = vpack.c.bf16 %v435_v57, %v435_v57  ;;  %v378_v60 = vpop.f32.mrf.mxu2 }
  0xb7   : > { %v432_v61 = vsel %vm416_vm3, %v398_v56, %v424_v58  ;;  %v379_v62 = vadd.f32 %v781_v40, %v378_v60  ;;  %v407_v63 = vpop.f32.mrf.mxu3 }
  0xb8   : > { %452 = vst.msk [vmem:[%s788_s4 + $0x10] sm:$0xf] %vm447_vm1, %v443_v59  ;;  %v440_v0 = vpack.c.bf16 %v432_v61, %v432_v61  ;;  %v371_v1 = vpop.f32.mrf.mxu0 }
  0xb9   : > { %v408_v2 = vadd.f32 %v407_v63, %v379_v62  ;;  %v372_v3 = vadd.f32 %v781_v40, %v371_v1  ;;  %v400_v4 = vpop.f32.mrf.mxu1 }
  0xba   : > { %449 = vst.msk [vmem:[%s788_s4 + $0x4] sm:$0xf] %vm447_vm1, %v440_v0 }
  0xbb   : > { %vm420_vm4 = vcmp.ge.f32.partialorder %v408_v2, 0.0  ;;  %v428_v5 = vmul.f32 0.2, %v408_v2  ;;  %v401_v6 = vadd.f32 %v400_v4, %v372_v3 }
  0xbd   : > { %v436_v7 = vsel %vm420_vm4, %v408_v2, %v428_v5  ;;  %vm417_vm5 = vcmp.ge.f32.partialorder %v401_v6, 0.0  ;;  %v425_v8 = vmul.f32 0.2, %v401_v6 }
  0xbe   : > { %v444_v9 = vpack.c.bf16 %v436_v7, %v436_v7  ;;  %v381_v10 = vpop.f32.mrf.mxu2 }
  0xbf   : > { %v433_v11 = vsel %vm417_vm5, %v401_v6, %v425_v8  ;;  %v382_v12 = vadd.f32 %v781_v40, %v381_v10  ;;  %v410_v13 = vpop.f32.mrf.mxu3 }
  0xc0   : > { %453 = vst.msk [vmem:[%s788_s4 + $0x14] sm:$0xf] %vm447_vm1, %v444_v9  ;;  %v441_v14 = vpack.c.bf16 %v433_v11, %v433_v11  ;;  %v373_v15 = vpop.f32.mrf.mxu0 }
  0xc1   : > { %v411_v16 = vadd.f32 %v410_v13, %v382_v12  ;;  %v374_v17 = vadd.f32 %v781_v40, %v373_v15  ;;  %v402_v18 = vpop.f32.mrf.mxu1 }
  0xc2   : > { %450 = vst.msk [vmem:[%s788_s4 + $0x8] sm:$0xf] %vm447_vm1, %v441_v14 }
  0xc3   : > { %vm421_vm6 = vcmp.ge.f32.partialorder %v411_v16, 0.0  ;;  %v429_v19 = vmul.f32 0.2, %v411_v16  ;;  %v403_v20 = vadd.f32 %v402_v18, %v374_v17 }
  0xc5   : > { %v437_v21 = vsel %vm421_vm6, %v411_v16, %v429_v19  ;;  %vm418_vm7 = vcmp.ge.f32.partialorder %v403_v20, 0.0  ;;  %v426_v22 = vmul.f32 0.2, %v403_v20 }
  0xc6   : > { %v445_v23 = vpack.c.bf16 %v437_v21, %v437_v21  ;;  %v383_v24 = vpop.f32.mrf.mxu2 }
  0xc7   : > { %v434_v25 = vsel %vm418_vm7, %v403_v20, %v426_v22  ;;  %v384_v26 = vadd.f32 %v781_v40, %v383_v24  ;;  %v412_v28 = vpop.f32.mrf.mxu3 }
  0xc8   : > { %454 = vst.msk [vmem:[%s788_s4 + $0x18] sm:$0xf] %vm447_vm1, %v445_v23  ;;  %v442_v27 = vpack.c.bf16 %v434_v25, %v434_v25 }
  0xc9   : > { %v413_v29 = vadd.f32 %v412_v28, %v384_v26 }
  0xca   : > { %451 = vst.msk [vmem:[%s788_s4 + $0xc] sm:$0xf] %vm447_vm1, %v442_v27 }
  0xcb   : > { %vm422_vm8 = vcmp.ge.f32.partialorder %v413_v29, 0.0  ;;  %v430_v30 = vmul.f32 0.2, %v413_v29 }
  0xcd   : > { %v438_v31 = vsel %vm422_vm8, %v413_v29, %v430_v30 }
  0xce   : > { %v446_v32 = vpack.c.bf16 %v438_v31, %v438_v31 }
  0xd0   : > { %455 = vst.msk [vmem:[%s788_s4 + $0x1c] sm:$0xf] %vm447_vm1, %v446_v32 }
  0xd1 PF: > { %s13_s12 = sadd.s32 1, %s676_s12  }
  0xd2   : > { %p10_p4 = scmp.ge.s32.totalorder %s13_s12, 4  }
  0xd4   :  { %12 = sbr.rel (!%p10_p4) target bundleno = 1 (0x1), region = 62 }

// kernel: discriminator_forward.9
= control target key start
LH: loop header
LB: loop body
LE: loop exit
PB: predicated region body
PF: predicated region fallthrough
CT: control target
= control target key end

     0   :  { %s814_s12 = smov 0   ;;  %s934_s0 = inlined_call_operand.vmem [shape: bf16[32,512], index: 0, kind: input, shape index: {}]   ;;  %s935_s1 = inlined_call_operand.vmem [shape: bf16[512,64], index: 1, kind: input, shape index: {}]   ;;  %s936_s2 = inlined_call_operand.vmem [shape: f32[1,64], index: 2, kind: input, shape index: {}]   ;;  %s937_s3 = inlined_call_operand.vmem [shape: bf16[32,64], index: 3, kind: output, shape index: {}]  }
   0x1 LB: > { %s584_s13 = sadd.s32 4294967295, %s792_s12   ;;  %p588_p0 = scmp.ge.s32.totalorder %s792_s12, 1  ;;  %s792_s12 = sphi %s814_s12, %s13_s12  }
   0x2   : > { %p139_p1 = scmp.lt.s32.totalorder %s792_s12, 3 }
   0x4   : > { %p140_p2 = pnand %p588_p0, %p139_p1 }
   0x5   : > { %s589_s11 = sshll.u32 (!%p140_p2), %s584_s13, 1 }
   0x6   : > { %143 = sbr.rel (%p140_p2) target bundleno = 195 (0xc3), region = 32  ;;  %p165_p3 = scmp.lt.s32.totalorder (!%p140_p2), %s589_s11, 3 }
   0xb   : > { %v752_v0 = vld [vmem:[%s935_s1 + $0x38] sm:$0xff]  ;;  %v751_v4 = vld [vmem:[%s935_s1 + $0x30] sm:$0xff]  ;;  %v750_v8 = vld [vmem:[%s935_s1 + $0x28] sm:$0xff]  ;;  %s939_s11 = smov (!%p165_p3, %s589_s11), 3  ;;  %vm525_vm1 = vcmask 519168  }
   0xc   : > { %v760_v1 = vld [vmem:[%s935_s1 + $0x78] sm:$0xff]  ;;  %461 = vmatpush.bf16.msra.mxu0 %v752_v0  ;;  %v759_v5 = vld [vmem:[%s935_s1 + $0x70] sm:$0xff]  ;;  %v758_v9 = vld [vmem:[%s935_s1 + $0x68] sm:$0xff]  ;;  %s740_s10 = sshll.u32 %s939_s11, 4  ;;  %s593_s7 = sshll.u32 %s939_s11, 2 }
   0xd   : > { %v768_v2 = vld [vmem:[%s935_s1 + $0xb8] sm:$0xff]  ;;  %475 = vmatpush.bf16.msra.mxu1 %v760_v1  ;;  %v767_v6 = vld [vmem:[%s935_s1 + $0xb0] sm:$0xff]  ;;  %v766_v10 = vld [vmem:[%s935_s1 + $0xa8] sm:$0xff]  ;;  %s169_s20 = scalar_lea.vmem %s934_s0, %s740_s10  ;;  %s175_s10 = scalar_lea.vmem %s937_s3, %s593_s7 }
   0xe   : > { %v776_v3 = vld [vmem:[%s935_s1 + $0xf8] sm:$0xff]  ;;  %489 = vmatpush.bf16.msra.mxu2 %v768_v2  ;;  %v775_v7 = vld [vmem:[%s935_s1 + $0xf0] sm:$0xff]  ;;  %v774_v11 = vld [vmem:[%s935_s1 + $0xe8] sm:$0xff] }
   0xf   : > { %503 = vmatpush.bf16.msra.mxu3 %v776_v3  ;;  %v749_v12 = vld [vmem:[%s935_s1 + $0x20] sm:$0xff]  ;;  %v748_v16 = vld [vmem:[%s935_s1 + $0x18] sm:$0xff]  ;;  %v747_v20 = vld [vmem:[%s935_s1 + $0x10] sm:$0xff] }
  0x10   : > { %462 = vmatpush.bf16.msra.mxu0 %v751_v4  ;;  %v757_v13 = vld [vmem:[%s935_s1 + $0x60] sm:$0xff]  ;;  %v756_v17 = vld [vmem:[%s935_s1 + $0x58] sm:$0xff]  ;;  %v755_v21 = vld [vmem:[%s935_s1 + $0x50] sm:$0xff] }
  0x11   : > { %476 = vmatpush.bf16.msra.mxu1 %v759_v5  ;;  %v765_v14 = vld [vmem:[%s935_s1 + $0xa0] sm:$0xff]  ;;  %v764_v18 = vld [vmem:[%s935_s1 + $0x98] sm:$0xff]  ;;  %v763_v22 = vld [vmem:[%s935_s1 + $0x90] sm:$0xff] }
  0x12   : > { %490 = vmatpush.bf16.msra.mxu2 %v767_v6  ;;  %v773_v15 = vld [vmem:[%s935_s1 + $0xe0] sm:$0xff]  ;;  %v772_v19 = vld [vmem:[%s935_s1 + $0xd8] sm:$0xff]  ;;  %v771_v23 = vld [vmem:[%s935_s1 + $0xd0] sm:$0xff] }
  0x13   : > { %504 = vmatpush.bf16.msra.mxu3 %v775_v7  ;;  %v746_v24 = vld [vmem:[%s935_s1 + $0x8] sm:$0xff]  ;;  %v745_v28 = vld [vmem:[%s935_s1] sm:$0xff]  ;;  %v743_v33 = vld [vmem:[%s169_s20 + $0xc] sm:$0xf0] }
  0x14   : > { %463 = vmatpush.bf16.msra.mxu0 %v750_v8  ;;  %v754_v25 = vld [vmem:[%s935_s1 + $0x48] sm:$0xff]  ;;  %v753_v29 = vld [vmem:[%s935_s1 + $0x40] sm:$0xff]  ;;  %v598_v35 = vld [vmem:[%s169_s20 + $0x10] sm:$0xf0] }
  0x15   : > { %477 = vmatpush.bf16.msra.mxu1 %v758_v9  ;;  %v762_v26 = vld [vmem:[%s935_s1 + $0x88] sm:$0xff]  ;;  %v761_v30 = vld [vmem:[%s935_s1 + $0x80] sm:$0xff]  ;;  %v744_v37 = vld [vmem:[%s169_s20 + $0x14] sm:$0xf0] }
  0x16   : > { %491 = vmatpush.bf16.msra.mxu2 %v766_v10  ;;  %v770_v27 = vld [vmem:[%s935_s1 + $0xc8] sm:$0xff]  ;;  %v769_v31 = vld [vmem:[%s935_s1 + $0xc0] sm:$0xff]  ;;  %v606_v39 = vld [vmem:[%s169_s20 + $0x18] sm:$0xf0] }
  0x17   : > { %505 = vmatpush.bf16.msra.mxu3 %v774_v11  ;;  %v596_v32 = vld [vmem:[%s169_s20] sm:$0xf]  ;;  %v741_v34 = vld [vmem:[%s169_s20 + $0x4] sm:$0xf]  ;;  %v604_v36 = vld [vmem:[%s169_s20 + $0x8] sm:$0xf] }
  0x18   : > { %464 = vmatpush.bf16.msra.mxu0 %v749_v12  ;;  %v742_v38 = vld [vmem:[%s169_s20 + $0xc] sm:$0xf]  ;;  %v597_v40 = vor.u32 %v743_v33, %v596_v32  ;;  %v601_v41 = vor.u32 %v741_v34, %v598_v35  ;;  %v605_v42 = vor.u32 %v744_v37, %v604_v36  ;;  %v785_v44 = vld [vmem:[%s936_s2] ss:$0 sm:$0xff] }
  0x19   : > { %478 = vmatpush.bf16.msra.mxu1 %v757_v13  ;;  %v609_v43 = vor.u32 %v742_v38, %v606_v39 }
  0x1a   : > { %492 = vmatpush.bf16.msra.mxu2 %v765_v14 }
  0x1b   : > { %506 = vmatpush.bf16.msra.mxu3 %v773_v15 }
  0x1c   : > { %465 = vmatpush.bf16.msra.mxu0 %v748_v16 }
  0x1d   : > { %479 = vmatpush.bf16.msra.mxu1 %v756_v17 }
  0x1e   : > { %493 = vmatpush.bf16.msra.mxu2 %v764_v18 }
  0x1f   : > { %507 = vmatpush.bf16.msra.mxu3 %v772_v19 }
  0x20   : > { %466 = vmatpush.bf16.msra.mxu0 %v747_v20 }
  0x21   : > { %480 = vmatpush.bf16.msra.mxu1 %v755_v21 }
  0x22   : > { %494 = vmatpush.bf16.msra.mxu2 %v763_v22 }
  0x23   : > { %508 = vmatpush.bf16.msra.mxu3 %v771_v23 }
  0x24   : > { %467 = vmatpush.bf16.msra.mxu0 %v746_v24 }
  0x25   : > { %481 = vmatpush.bf16.msra.mxu1 %v754_v25 }
  0x26   : > { %495 = vmatpush.bf16.msra.mxu2 %v762_v26 }
  0x27   : > { %509 = vmatpush.bf16.msra.mxu3 %v770_v27 }
  0x28   : > { %468 = vmatpush.bf16.msra.mxu0 %v745_v28 }
  0x29   : > { %482 = vmatpush.bf16.msra.mxu1 %v753_v29 }
  0x2a   : > { %496 = vmatpush.bf16.msra.mxu2 %v761_v30 }
  0x2b   : > { %510 = vmatpush.bf16.msra.mxu3 %v769_v31  ;;  %469 = vmatmul.bf16.vlgmr.msra.gmra.mxu0 %v597_v40 }
  0x2c   : > { %483 = vmatmul.bf16.vlgmr.msra.gmra.mxu1 %v601_v41 }
  0x2d   : > { %497 = vmatmul.bf16.vlgmr.msra.gmra.mxu2 %v605_v42 }
  0x2e   : > { %511 = vmatmul.bf16.vlgmr.msra.gmra.mxu3 %v609_v43 }
  0xa8   : > { %v470_v45 = vpop.f32.mrf.mxu0 }
  0xa9   : > { %v471_v46 = vadd.f32 %v785_v44, %v470_v45  ;;  %v484_v47 = vpop.f32.mrf.mxu1 }
  0xab   : > { %v485_v48 = vadd.f32 %v484_v47, %v471_v46 }
  0xb0   : > { %v498_v49 = vpop.f32.mrf.mxu2  ;;  %v472_v52 = vpop.f32.mrf.mxu0 }
  0xb1   : > { %v512_v50 = vpop.f32.mrf.mxu3  ;;  %v499_v51 = vadd.f32 %v498_v49, %v485_v48  ;;  %v473_v54 = vadd.f32 %v785_v44, %v472_v52  ;;  %v486_v56 = vpop.f32.mrf.mxu1 }
  0xb3   : > { %v513_v53 = vadd.f32 %v512_v50, %v499_v51  ;;  %v487_v58 = vadd.f32 %v486_v56, %v473_v54 }
  0xb5   : > { %vm517_vm0 = vcmp.ge.f32.partialorder %v513_v53, 0.0  ;;  %v519_v55 = vmul.f32 0.2, %v513_v53 }
  0xb7   : > { %v521_v57 = vsel %vm517_vm0, %v513_v53, %v519_v55 }
  0xb8   : > { %v523_v59 = vpack.c.bf16 %v521_v57, %v521_v57  ;;  %v500_v60 = vpop.f32.mrf.mxu2 }
  0xb9   : > { %v501_v61 = vadd.f32 %v500_v60, %v487_v58  ;;  %v514_v62 = vpop.f32.mrf.mxu3 }
  0xba   : > { %526 = vst.msk [vmem:[%s175_s10] sm:$0xf] %vm525_vm1, %v523_v59 }
  0xbb   : > { %v515_v63 = vadd.f32 %v514_v62, %v501_v61 }
  0xbd   : > { %vm518_vm2 = vcmp.ge.f32.partialorder %v515_v63, 0.0  ;;  %v520_v0 = vmul.f32 0.2, %v515_v63 }
  0xbf   : > { %v522_v1 = vsel %vm518_vm2, %v515_v63, %v520_v0 }
  0xc0   : > { %v524_v2 = vpack.c.bf16 %v522_v1, %v522_v1 }
  0xc2   : > { %527 = vst.msk [vmem:[%s175_s10 + $0x4] sm:$0xf] %vm525_vm1, %v524_v2 }
  0xc3 PF: > { %s13_s12 = sadd.s32 1, %s792_s12  }
  0xc4   : > { %p10_p4 = scmp.ge.s32.totalorder %s13_s12, 4  }
  0xc6   :  { %12 = sbr.rel (!%p10_p4) target bundleno = 1 (0x1), region = 62 }

// kernel: discriminator_forward.10
= control target key start
LH: loop header
LB: loop body
LE: loop exit
PB: predicated region body
PF: predicated region fallthrough
CT: control target
= control target key end

     0   :  { %vm36_vm0 = vcmask 261120   ;;  %vm57_vm2 = vcmask 122880   ;;  %s110_s1 = inlined_call_operand.vmem [shape: bf16[32,16], index: 1, kind: input, shape index: {}]   ;;  %s111_s2 = inlined_call_operand.vmem [shape: f32[1,16], index: 2, kind: input, shape index: {}]   ;;  %s112_s0 = inlined_call_operand.vmem [shape: bf16[2,32], index: 0, kind: input, shape index: {}]   ;;  %s113_s3 = inlined_call_operand.vmem [shape: bf16[2,16], index: 3, kind: output, shape index: {}]  }
   0x1   :  { %v73_v0 = vld [vmem:[%s110_s1 + $0x8] sm:$0xff]  ;;  %v72_v1 = vld [vmem:[%s110_s1] sm:$0xff] }
   0x2   :  { %46 = vmatpush.bf16.msra.mxu0 %v73_v0  ;;  %v15_v2 = vld [vmem:[%s112_s0] sm:$0x1] }
   0x3   :  { %v74_v3 = vld [vmem:[%s111_s2] ss:$0 sm:$0xff] }
   0x6   :  { %47 = vmatpush.bf16.msra.mxu0 %v72_v1 }
   0x9   :  { %71 = vmatmul.msk.bf16.vlgmr.msra.gmra.mxu0 %vm36_vm0, %v15_v2 }
  0x86   :  { %v49_v4 = vpop.f32.mrf.mxu0 }
  0x87   :  { %v50_v5 = vadd.f32 %v74_v3, %v49_v4 }
  0x89   :  { %vm53_vm1 = vcmp.ge.f32.partialorder %v50_v5, 0.0  ;;  %v54_v6 = vmul.f32 0.2, %v50_v5 }
  0x8b   :  { %v55_v7 = vsel %vm53_vm1, %v50_v5, %v54_v6 }
  0x8c   :  { %v56_v8 = vpack.c.bf16 %v55_v7, %v55_v7 }
  0x8e   :  { %58 = vst.msk [vmem:[%s113_s3] sm:$0x1] %vm57_vm2, %v56_v8  ;;  %v51_v9 = vpop.f32.mrf.mxu0 }

// kernel: discriminator_forward.11
= control target key start
LH: loop header
LB: loop body
LE: loop exit
PB: predicated region body
PF: predicated region fallthrough
CT: control target
= control target key end

     0   :  { %vm816_vm0 = vcmask 1024   ;;  %s1507_s1 = inlined_call_operand.vmem [shape: bf16[1280,1], index: 1, kind: input, shape index: {}]   ;;  %s1508_s0 = inlined_call_operand.vmem [shape: bf16[2,1280], index: 0, kind: input, shape index: {}]   ;;  %s1509_s2 = inlined_call_operand.<no memory space> [shape: f32[1,1], index: 2, kind: input, shape index: {}]   ;;  %s1510_s3 = inlined_call_operand.vmem [shape: f32[2,1], index: 3, kind: output, shape index: {}]  }
   0x1   :  { %v1149_v0 = vld [vmem:[%s1507_s1 + $0x38] sm:$0xff]  ;;  %v1148_v4 = vld [vmem:[%s1507_s1 + $0x30] sm:$0xff]  ;;  %v1147_v8 = vld [vmem:[%s1507_s1 + $0x28] sm:$0xff] }
   0x2   :  { %v1157_v1 = vld [vmem:[%s1507_s1 + $0x78] sm:$0xff]  ;;  %686 = vmatpush.bf16.msra.mxu0 %v1149_v0  ;;  %v1156_v5 = vld [vmem:[%s1507_s1 + $0x70] sm:$0xff]  ;;  %v1155_v9 = vld [vmem:[%s1507_s1 + $0x68] sm:$0xff] }
   0x3   :  { %v1165_v2 = vld [vmem:[%s1507_s1 + $0xb8] sm:$0xff]  ;;  %699 = vmatpush.bf16.msra.mxu1 %v1157_v1  ;;  %v1164_v6 = vld [vmem:[%s1507_s1 + $0xb0] sm:$0xff]  ;;  %v1163_v10 = vld [vmem:[%s1507_s1 + $0xa8] sm:$0xff] }
   0x4   :  { %v1173_v3 = vld [vmem:[%s1507_s1 + $0xf8] sm:$0xff]  ;;  %712 = vmatpush.bf16.msra.mxu2 %v1165_v2  ;;  %v1172_v7 = vld [vmem:[%s1507_s1 + $0xf0] sm:$0xff]  ;;  %v1171_v11 = vld [vmem:[%s1507_s1 + $0xe8] sm:$0xff] }
   0x5   :  { %725 = vmatpush.bf16.msra.mxu3 %v1173_v3  ;;  %v1146_v12 = vld [vmem:[%s1507_s1 + $0x20] sm:$0xff]  ;;  %v1145_v16 = vld [vmem:[%s1507_s1 + $0x18] sm:$0xff]  ;;  %v1144_v21 = vld [vmem:[%s1507_s1 + $0x10] sm:$0xff] }
   0x6   :  { %687 = vmatpush.bf16.msra.mxu0 %v1148_v4  ;;  %v1154_v13 = vld [vmem:[%s1507_s1 + $0x60] sm:$0xff]  ;;  %v1153_v17 = vld [vmem:[%s1507_s1 + $0x58] sm:$0xff]  ;;  %v1152_v22 = vld [vmem:[%s1507_s1 + $0x50] sm:$0xff] }
   0x7   :  { %700 = vmatpush.bf16.msra.mxu1 %v1156_v5  ;;  %v1162_v14 = vld [vmem:[%s1507_s1 + $0xa0] sm:$0xff]  ;;  %v1161_v18 = vld [vmem:[%s1507_s1 + $0x98] sm:$0xff]  ;;  %v1160_v23 = vld [vmem:[%s1507_s1 + $0x90] sm:$0xff] }
   0x8   :  { %713 = vmatpush.bf16.msra.mxu2 %v1164_v6  ;;  %v1170_v15 = vld [vmem:[%s1507_s1 + $0xe0] sm:$0xff]  ;;  %v1169_v19 = vld [vmem:[%s1507_s1 + $0xd8] sm:$0xff]  ;;  %v1168_v24 = vld [vmem:[%s1507_s1 + $0xd0] sm:$0xff] }
   0x9   :  { %726 = vmatpush.bf16.msra.mxu3 %v1172_v7  ;;  %v16_v20 = vld [vmem:[%s1508_s0] sm:$0xff]  ;;  %v1143_v25 = vld [vmem:[%s1507_s1 + $0x8] sm:$0xff]  ;;  %v1181_v32 = vld [vmem:[%s1507_s1 + $0x138] sm:$0xff] }
   0xa   :  { %688 = vmatpush.bf16.msra.mxu0 %v1147_v8  ;;  %183 = vst [vmem:[#allocation1] ss:$9 sm:$0xff] %v16_v20  ;;  %v1151_v26 = vld [vmem:[%s1507_s1 + $0x48] sm:$0xff]  ;;  %v1142_v29 = vld [vmem:[%s1507_s1] sm:$0xff]  ;;  %v1189_v33 = vld [vmem:[%s1507_s1 + $0x178] sm:$0xff] }
   0xb   :  { %701 = vmatpush.bf16.msra.mxu1 %v1155_v9  ;;  %v1159_v27 = vld [vmem:[%s1507_s1 + $0x88] sm:$0xff]  ;;  %v1150_v30 = vld [vmem:[%s1507_s1 + $0x40] sm:$0xff]  ;;  %v1197_v34 = vld [vmem:[%s1507_s1 + $0x1b8] sm:$0xff] }
   0xc   :  { %714 = vmatpush.bf16.msra.mxu2 %v1163_v10  ;;  %v1167_v28 = vld [vmem:[%s1507_s1 + $0xc8] sm:$0xff]  ;;  %v1158_v31 = vld [vmem:[%s1507_s1 + $0x80] sm:$0xff]  ;;  %v1205_v36 = vld [vmem:[%s1507_s1 + $0x1f8] sm:$0xff] }
   0xd   :  { %727 = vmatpush.bf16.msra.mxu3 %v1171_v11  ;;  %v1166_v35 = vld [vmem:[%s1507_s1 + $0xc0] sm:$0xff]  ;;  %v1180_v38 = vld [vmem:[%s1507_s1 + $0x130] sm:$0xff]  ;;  %v17_v42 = vld [vmem:[%s1508_s0 + $0x8] sm:$0x3] }
   0xe   :  { %689 = vmatpush.bf16.msra.mxu0 %v1146_v12  ;;  %v1188_v39 = vld [vmem:[%s1507_s1 + $0x170] sm:$0xff]  ;;  %v1179_v50 = vld [vmem:[%s1507_s1 + $0x128] sm:$0xff]  ;;  %v1178_v54 = vld [vmem:[%s1507_s1 + $0x120] sm:$0xff]  ;;  %v8_v12 = vstv %s1509_s2 }
   0xf   :  { %702 = vmatpush.bf16.msra.mxu1 %v1154_v13  ;;  %v1196_v41 = vld [vmem:[%s1507_s1 + $0x1b0] sm:$0xff]  ;;  %v1187_v51 = vld [vmem:[%s1507_s1 + $0x168] sm:$0xff]  ;;  %v1186_v55 = vld [vmem:[%s1507_s1 + $0x160] sm:$0xff]  ;;  %9 = vst [vmem:[#allocation2] sm:$0x1] %v8_v12 }
  0x10   :  { %715 = vmatpush.bf16.msra.mxu2 %v1162_v14  ;;  %v1204_v44 = vld [vmem:[%s1507_s1 + $0x1f0] sm:$0xff]  ;;  %v1195_v52 = vld [vmem:[%s1507_s1 + $0x1a8] sm:$0xff]  ;;  %v1194_v56 = vld [vmem:[%s1507_s1 + $0x1a0] sm:$0xff] }
  0x11   :  { %728 = vmatpush.bf16.msra.mxu3 %v1170_v15  ;;  %v184_v37 = vld [vmem:[#allocation1] sm:$0xff]  ;;  %v186_v40 = vld [vmem:[#allocation1 + $0x12] sm:$0xff]  ;;  %v185_v43 = vld [vmem:[#allocation1 + $0x9] sm:$0xff] }
  0x12   :  { %690 = vmatpush.bf16.msra.mxu0 %v1145_v16  ;;  %v187_v45 = vld [vmem:[#allocation1 + $0x1b] sm:$0xff]  ;;  %v1371_v47 = vld [vmem:[#allocation1 + $0x24] sm:$0xff]  ;;  %v1375_v49 = vld [vmem:[#allocation1 + $0x2d] sm:$0xff] }
  0x13   :  { %703 = vmatpush.bf16.msra.mxu1 %v1153_v17  ;;  %v1369_v46 = vld [vmem:[#allocation1 + $0x36] sm:$0xff]  ;;  %v1373_v48 = vld [vmem:[#allocation1 + $0x3f] sm:$0xff]  ;;  %v1203_v53 = vld [vmem:[%s1507_s1 + $0x1e8] sm:$0xff] }
  0x14   :  { %716 = vmatpush.bf16.msra.mxu2 %v1161_v18  ;;  %193 = vst [vmem:[#allocation1] ss:$9 sm:$0xff] %v17_v42  ;;  %v1202_v57 = vld [vmem:[%s1507_s1 + $0x1e0] sm:$0xff]  ;;  %v1177_v58 = vld [vmem:[%s1507_s1 + $0x118] sm:$0xff]  ;;  %v1176_v62 = vld [vmem:[%s1507_s1 + $0x110] sm:$0xff] }
  0x15   :  { %729 = vmatpush.bf16.msra.mxu3 %v1169_v19  ;;  %v1185_v59 = vld [vmem:[%s1507_s1 + $0x158] sm:$0xff]  ;;  %v1184_v63 = vld [vmem:[%s1507_s1 + $0x150] sm:$0xff]  ;;  %v1175_v2 = vld [vmem:[%s1507_s1 + $0x108] sm:$0xff] }
  0x16   :  { %691 = vmatpush.bf16.msra.mxu0 %v1144_v21  ;;  %v1193_v60 = vld [vmem:[%s1507_s1 + $0x198] sm:$0xff]  ;;  %v1192_v0 = vld [vmem:[%s1507_s1 + $0x190] sm:$0xff]  ;;  %v1183_v3 = vld [vmem:[%s1507_s1 + $0x148] sm:$0xff] }
  0x17   :  { %704 = vmatpush.bf16.msra.mxu1 %v1152_v22  ;;  %v1201_v61 = vld [vmem:[%s1507_s1 + $0x1d8] sm:$0xff]  ;;  %v1200_v1 = vld [vmem:[%s1507_s1 + $0x1d0] sm:$0xff]  ;;  %v1191_v4 = vld [vmem:[%s1507_s1 + $0x188] sm:$0xff] }
  0x18   :  { %717 = vmatpush.bf16.msra.mxu2 %v1160_v23  ;;  %v1199_v5 = vld [vmem:[%s1507_s1 + $0x1c8] sm:$0xff]  ;;  %v1174_v6 = vld [vmem:[%s1507_s1 + $0x100] sm:$0xff]  ;;  %v1213_v9 = vld [vmem:[%s1507_s1 + $0x238] sm:$0xff] }
  0x19   :  { %730 = vmatpush.bf16.msra.mxu3 %v1168_v24  ;;  %v1182_v7 = vld [vmem:[%s1507_s1 + $0x140] sm:$0xff]  ;;  %v1221_v10 = vld [vmem:[%s1507_s1 + $0x278] sm:$0xff]  ;;  %v1212_v13 = vld [vmem:[%s1507_s1 + $0x230] sm:$0xff] }
  0x1a   :  { %692 = vmatpush.bf16.msra.mxu0 %v1143_v25  ;;  %v1190_v8 = vld [vmem:[%s1507_s1 + $0x180] sm:$0xff]  ;;  %v1220_v14 = vld [vmem:[%s1507_s1 + $0x270] sm:$0xff]  ;;  %v1211_v15 = vld [vmem:[%s1507_s1 + $0x228] sm:$0xff] }
  0x1b   :  { %705 = vmatpush.bf16.msra.mxu1 %v1151_v26  ;;  %v1198_v11 = vld [vmem:[%s1507_s1 + $0x1c0] sm:$0xff]  ;;  %v1219_v16 = vld [vmem:[%s1507_s1 + $0x268] sm:$0xff]  ;;  %v1209_v19 = vld [vmem:[%s1507_s1 + $0x218] sm:$0xff] }
  0x1c   :  { %718 = vmatpush.bf16.msra.mxu2 %v1159_v27  ;;  %v1210_v17 = vld [vmem:[%s1507_s1 + $0x220] sm:$0xff]  ;;  %v1217_v20 = vld [vmem:[%s1507_s1 + $0x258] sm:$0xff]  ;;  %v1208_v21 = vld [vmem:[%s1507_s1 + $0x210] sm:$0xff] }
  0x1d   :  { %731 = vmatpush.bf16.msra.mxu3 %v1167_v28  ;;  %v1218_v18 = vld [vmem:[%s1507_s1 + $0x260] sm:$0xff]  ;;  %v1216_v22 = vld [vmem:[%s1507_s1 + $0x250] sm:$0xff]  ;;  %v1207_v23 = vld [vmem:[%s1507_s1 + $0x208] sm:$0xff] }
  0x1e   :  { %693 = vmatpush.bf16.msra.mxu0 %v1142_v29  ;;  %v1215_v24 = vld [vmem:[%s1507_s1 + $0x248] sm:$0xff]  ;;  %v1206_v25 = vld [vmem:[%s1507_s1 + $0x200] sm:$0xff] }
  0x1f   :  { %706 = vmatpush.bf16.msra.mxu1 %v1150_v30  ;;  %v1214_v26 = vld [vmem:[%s1507_s1 + $0x240] sm:$0xff]  ;;  %v195_v28 = vld [vmem:[#allocation1 + $0x9] sm:$0xff] }
  0x20   :  { %719 = vmatpush.bf16.msra.mxu2 %v1158_v31  ;;  %v194_v27 = vld [vmem:[#allocation1] sm:$0xff] }
  0x21   :  { %732 = vmatpush.bf16.msra.mxu3 %v1166_v35  ;;  %694 = vmatmul.bf16.vlgmr.msra.gmra.mxu0 %v184_v37  ;;  %v1222_v37 = vld [vmem:[#allocation2] ss:$0 sm:$0xff] }
  0x22   :  { %738 = vmatpush.bf16.msrb.mxu0 %v1181_v32  ;;  %707 = vmatmul.bf16.vlgmr.msra.gmra.mxu1 %v185_v43 }
  0x23   :  { %751 = vmatpush.bf16.msrb.mxu1 %v1189_v33  ;;  %720 = vmatmul.bf16.vlgmr.msra.gmra.mxu2 %v186_v40 }
  0x24   :  { %764 = vmatpush.bf16.msrb.mxu2 %v1197_v34  ;;  %733 = vmatmul.bf16.vlgmr.msra.gmra.mxu3 %v187_v45 }
  0x25   :  { %777 = vmatpush.bf16.msrb.mxu3 %v1205_v36 }
  0x26   :  { %739 = vmatpush.bf16.msrb.mxu0 %v1180_v38 }
  0x27   :  { %752 = vmatpush.bf16.msrb.mxu1 %v1188_v39 }
  0x28   :  { %765 = vmatpush.bf16.msrb.mxu2 %v1196_v41 }
  0x29   :  { %778 = vmatpush.bf16.msrb.mxu3 %v1204_v44 }
  0x2a   :  { %740 = vmatpush.bf16.msrb.mxu0 %v1179_v50 }
  0x2b   :  { %753 = vmatpush.bf16.msrb.mxu1 %v1187_v51 }
  0x2c   :  { %766 = vmatpush.bf16.msrb.mxu2 %v1195_v52 }
  0x2d   :  { %779 = vmatpush.bf16.msrb.mxu3 %v1203_v53 }
  0x2e   :  { %741 = vmatpush.bf16.msrb.mxu0 %v1178_v54 }
  0x2f   :  { %754 = vmatpush.bf16.msrb.mxu1 %v1186_v55 }
  0x30   :  { %767 = vmatpush.bf16.msrb.mxu2 %v1194_v56 }
  0x31   :  { %780 = vmatpush.bf16.msrb.mxu3 %v1202_v57 }
  0x32   :  { %742 = vmatpush.bf16.msrb.mxu0 %v1177_v58 }
  0x33   :  { %755 = vmatpush.bf16.msrb.mxu1 %v1185_v59 }
  0x34   :  { %768 = vmatpush.bf16.msrb.mxu2 %v1193_v60 }
  0x35   :  { %781 = vmatpush.bf16.msrb.mxu3 %v1201_v61 }
  0x36   :  { %743 = vmatpush.bf16.msrb.mxu0 %v1176_v62 }
  0x37   :  { %756 = vmatpush.bf16.msrb.mxu1 %v1184_v63 }
  0x38   :  { %769 = vmatpush.bf16.msrb.mxu2 %v1192_v0 }
  0x39   :  { %782 = vmatpush.bf16.msrb.mxu3 %v1200_v1 }
  0x3a   :  { %744 = vmatpush.bf16.msrb.mxu0 %v1175_v2 }
  0x3b   :  { %757 = vmatpush.bf16.msrb.mxu1 %v1183_v3 }
  0x3c   :  { %770 = vmatpush.bf16.msrb.mxu2 %v1191_v4 }
  0x3d   :  { %783 = vmatpush.bf16.msrb.mxu3 %v1199_v5 }
  0x3e   :  { %745 = vmatpush.bf16.msrb.mxu0 %v1174_v6 }
  0x3f   :  { %758 = vmatpush.bf16.msrb.mxu1 %v1182_v7 }
  0x40   :  { %771 = vmatpush.bf16.msrb.mxu2 %v1190_v8 }
  0x41   :  { %784 = vmatpush.bf16.msrb.mxu3 %v1198_v11  ;;  %746 = vmatmul.bf16.vlgmr.msrb.gmra.mxu0 %v1371_v47 }
  0x42   :  { %790 = vmatpush.bf16.msra.mxu0 %v1213_v9  ;;  %759 = vmatmul.bf16.vlgmr.msrb.gmra.mxu1 %v1375_v49 }
  0x43   :  { %803 = vmatpush.bf16.msra.mxu1 %v1221_v10  ;;  %772 = vmatmul.bf16.vlgmr.msrb.gmra.mxu2 %v1369_v46 }
  0x44   :  { %785 = vmatmul.bf16.vlgmr.msrb.gmra.mxu3 %v1373_v48 }
  0x46   :  { %791 = vmatpush.bf16.msra.mxu0 %v1212_v13 }
  0x47   :  { %804 = vmatpush.bf16.msra.mxu1 %v1220_v14 }
  0x4a   :  { %792 = vmatpush.bf16.msra.mxu0 %v1211_v15 }
  0x4b   :  { %805 = vmatpush.bf16.msra.mxu1 %v1219_v16 }
  0x4e   :  { %793 = vmatpush.bf16.msra.mxu0 %v1210_v17 }
  0x4f   :  { %806 = vmatpush.bf16.msra.mxu1 %v1218_v18 }
  0x52   :  { %794 = vmatpush.bf16.msra.mxu0 %v1209_v19 }
  0x53   :  { %807 = vmatpush.bf16.msra.mxu1 %v1217_v20 }
  0x56   :  { %795 = vmatpush.bf16.msra.mxu0 %v1208_v21 }
  0x57   :  { %808 = vmatpush.bf16.msra.mxu1 %v1216_v22 }
  0x5a   :  { %796 = vmatpush.bf16.msra.mxu0 %v1207_v23 }
  0x5b   :  { %809 = vmatpush.bf16.msra.mxu1 %v1215_v24 }
  0x5e   :  { %797 = vmatpush.bf16.msra.mxu0 %v1206_v25 }
  0x5f   :  { %810 = vmatpush.bf16.msra.mxu1 %v1214_v26 }
  0x61   :  { %798 = vmatmul.bf16.vlgmr.msra.gmra.mxu0 %v194_v27 }
  0x62   :  { %811 = vmatmul.bf16.vlgmr.msra.gmra.mxu1 %v195_v28 }
  0x9e   :  { %v695_v29 = vpop.f32.mrf.mxu0 }
  0x9f   :  { %v708_v30 = vpop.f32.mrf.mxu1  ;;  %v696_v39 = vadd.f32 %v1222_v37, %v695_v29 }
  0xa1   :  { %v709_v41 = vadd.f32 %v708_v30, %v696_v39 }
  0xa6   :  { %v721_v31 = vpop.f32.mrf.mxu2  ;;  %v697_v32 = vpop.f32.mrf.mxu0 }
  0xa7   :  { %v734_v33 = vpop.f32.mrf.mxu3  ;;  %v710_v34 = vpop.f32.mrf.mxu1  ;;  %v722_v44 = vadd.f32 %v721_v31, %v709_v41 }
  0xa9   :  { %v735_v47 = vadd.f32 %v734_v33, %v722_v44 }
  0xae   :  { %v723_v35 = vpop.f32.mrf.mxu2 }
  0xaf   :  { %v736_v36 = vpop.f32.mrf.mxu3 }
  0xbe   :  { %v747_v38 = vpop.f32.mrf.mxu0 }
  0xbf   :  { %v760_v40 = vpop.f32.mrf.mxu1  ;;  %v748_v49 = vadd.f32 %v747_v38, %v735_v47 }
  0xc1   :  { %v761_v51 = vadd.f32 %v760_v40, %v748_v49 }
  0xc6   :  { %v773_v42 = vpop.f32.mrf.mxu2  ;;  %v749_v43 = vpop.f32.mrf.mxu0 }
  0xc7   :  { %v762_v45 = vpop.f32.mrf.mxu1  ;;  %v786_v46 = vpop.f32.mrf.mxu3  ;;  %v774_v52 = vadd.f32 %v773_v42, %v761_v51 }
  0xc9   :  { %v787_v53 = vadd.f32 %v786_v46, %v774_v52 }
  0xce   :  { %v775_v48 = vpop.f32.mrf.mxu2 }
  0xcf   :  { %v788_v50 = vpop.f32.mrf.mxu3 }
  0xde   :  { %v799_v54 = vpop.f32.mrf.mxu0 }
  0xdf   :  { %v812_v55 = vpop.f32.mrf.mxu1  ;;  %v800_v56 = vadd.f32 %v799_v54, %v787_v53 }
  0xe1   :  { %v813_v57 = vadd.f32 %v812_v55, %v800_v56 }
  0xe3   :  { %817 = vst.msk [vmem:[%s1510_s3] sm:$0x3] %vm816_vm0, %v813_v57 }
  0xe6   :  { %v801_v58 = vpop.f32.mrf.mxu0 }
  0xe7   :  { %v814_v59 = vpop.f32.mrf.mxu1 }

</bundles_post_ra>
